<compile_context>
chip_gen: v6e
topology: v6e:2x2x1
jax: 0.10.0
libtpu: 0.0.40
codegen_flags: <defaults>
</compile_context>

<pallas_src>
import jax
import jax.numpy as jnp
from jax import lax
from jax.experimental import pallas as pl
from jax.experimental.pallas import tpu as pltpu

# ---------------- synthetic "BERT" config (small) ----------------
VOCAB    = 128
HIDDEN   = 32
N_HEADS  = 2
HEAD_DIM = HIDDEN // N_HEADS
N_LAYERS = 2
FFN      = 64
MAX_POS  = 16
CLS_NUM  = 7            # e.g. 7 emotion classes
CLS_PAD  = 128          # lane-dense classifier output (sliced to CLS_NUM outside)
LN_EPS   = 1e-12
DTYPE    = jnp.float32
ATTN_SCALE = 1.0 / float(HEAD_DIM) ** 0.5


# ---------------- in-kernel helpers ----------------
def _ln(x, g, b):
    mu = jnp.mean(x, axis=-1, keepdims=True)
    xc = x - mu
    var = jnp.mean(xc * xc, axis=-1, keepdims=True)
    return xc * lax.rsqrt(var + LN_EPS) * g + b


# ---------------- fused encoder kernel (one batch element per grid step) ----
def _encoder_kernel(ids_ref, mask_ref, word_ref, pos_ref, type_ref,
                    eg_ref, eb_ref,
                    wqkv_ref, bqkv_ref, wo_ref, bo_ref, ln1g_ref, ln1b_ref,
                    w1_ref, b1_ref, w2_ref, b2_ref, ln2g_ref, ln2b_ref,
                    wc_ref, bc_ref, o_ref):
    ids = ids_ref[0]                                   # (S, 1) int32
    S = ids.shape[0]

    # --- embeddings: in-kernel one-hot gather + pos + type, then LayerNorm
    iota = lax.broadcasted_iota(jnp.int32, (S, VOCAB), 1)
    onehot = (iota == ids).astype(DTYPE)               # (S, VOCAB)
    h = jnp.dot(onehot, word_ref[...], preferred_element_type=jnp.float32)
    # token_type_ids assumed all zero (only type_emb[0] is used)
    h = h + pos_ref[...] + type_ref[...]               # (S, H)
    h = _ln(h, eg_ref[...], eb_ref[...])

    # --- additive attention bias from padding mask (over key positions)
    bias = (1.0 - mask_ref[0]) * (-1e9)                # (1, S)

    for li in range(N_LAYERS):
        # fused QKV projection: (S, H) @ (H, 3H) + bias
        qkv = jnp.dot(h, wqkv_ref[li], preferred_element_type=jnp.float32)
        qkv = qkv + bqkv_ref[li]                       # (S, 3H)

        wo_li = wo_ref[li]                             # (H, H)
        attn_acc = None
        for hd in range(N_HEADS):
            q = qkv[:, hd * HEAD_DIM:(hd + 1) * HEAD_DIM]
            k = qkv[:, HIDDEN + hd * HEAD_DIM:HIDDEN + (hd + 1) * HEAD_DIM]
            v = qkv[:, 2 * HIDDEN + hd * HEAD_DIM:2 * HIDDEN + (hd + 1) * HEAD_DIM]
            s = lax.dot_general(q, k, (((1,), (1,)), ((), ())),
                                preferred_element_type=jnp.float32)
            s = s * ATTN_SCALE + bias                  # (S, S)
            m = jnp.max(s, axis=-1, keepdims=True)
            p = jnp.exp(s - m)
            p = p * pl.reciprocal(jnp.sum(p, axis=-1, keepdims=True), approx=True)
            ctx_h = jnp.dot(p, v, preferred_element_type=jnp.float32)  # (S, Dh)
            # merge heads by summing per-head output projections (== concat @ Wo)
            part = jnp.dot(ctx_h, wo_li[hd * HEAD_DIM:(hd + 1) * HEAD_DIM, :],
                           preferred_element_type=jnp.float32)          # (S, H)
            attn_acc = part if attn_acc is None else attn_acc + part
        attn_out = attn_acc + bo_ref[li]

        h1 = _ln(h + attn_out, ln1g_ref[li], ln1b_ref[li])

        ff = jnp.dot(h1, w1_ref[li], preferred_element_type=jnp.float32) + b1_ref[li]
        # TODO(synk): HF BERT uses exact (erf) GELU; tanh approximation used
        # here for robust Pallas/TPU lowering.
        ff = jax.nn.gelu(ff, approximate=True)
        ff = jnp.dot(ff, w2_ref[li], preferred_element_type=jnp.float32) + b2_ref[li]
        h = _ln(h1 + ff, ln2g_ref[li], ln2b_ref[li])

    # --- classifier on the CLS row only; lane-dense (padded-to-128) output
    cls = h[0:1, :]                                    # (1, H)
    logits = jnp.dot(cls, wc_ref[...], preferred_element_type=jnp.float32)
    logits = logits + bc_ref[...]                      # (1, CLS_PAD)
    o_ref[...] = logits.reshape(1, 1, CLS_PAD).astype(o_ref.dtype)


# ---------------- deterministic parameter init (already in fused layout) ----
def init_params(key):
    def dense(k, fan_in, fan_out):
        return 0.02 * jax.random.normal(k, (fan_in, fan_out), DTYPE)

    keys = jax.random.split(key, 4 + N_LAYERS)
    params = {
        "word_emb": dense(keys[0], VOCAB, HIDDEN),
        "pos_emb":  dense(keys[1], MAX_POS, HIDDEN),
        "type_row": dense(keys[2], 1, HIDDEN),          # token_type 0 row only
        "emb_ln_g": jnp.ones((1, HIDDEN), DTYPE),
        "emb_ln_b": jnp.zeros((1, HIDDEN), DTYPE),
    }
    wqkv, wo, w1, w2 = [], [], [], []
    for li in range(N_LAYERS):
        lk = jax.random.split(keys[4 + li], 6)
        wq = dense(lk[0], HIDDEN, HIDDEN)
        wk = dense(lk[1], HIDDEN, HIDDEN)
        wv = dense(lk[2], HIDDEN, HIDDEN)
        wqkv.append(jnp.concatenate([wq, wk, wv], axis=1))   # fused QKV weight
        wo.append(dense(lk[3], HIDDEN, HIDDEN))
        w1.append(dense(lk[4], HIDDEN, FFN))
        w2.append(dense(lk[5], FFN, HIDDEN))
    params.update(
        wqkv=jnp.stack(wqkv), bqkv=jnp.zeros((N_LAYERS, 1, 3 * HIDDEN), DTYPE),
        wo=jnp.stack(wo),     bo=jnp.zeros((N_LAYERS, 1, HIDDEN), DTYPE),
        ln1_g=jnp.ones((N_LAYERS, 1, HIDDEN), DTYPE),
        ln1_b=jnp.zeros((N_LAYERS, 1, HIDDEN), DTYPE),
        w1=jnp.stack(w1), b1=jnp.zeros((N_LAYERS, 1, FFN), DTYPE),
        w2=jnp.stack(w2), b2=jnp.zeros((N_LAYERS, 1, HIDDEN), DTYPE),
        ln2_g=jnp.ones((N_LAYERS, 1, HIDDEN), DTYPE),
        ln2_b=jnp.zeros((N_LAYERS, 1, HIDDEN), DTYPE),
    )
    wc = dense(keys[3], HIDDEN, CLS_NUM)
    params["wc"] = jnp.zeros((HIDDEN, CLS_PAD), DTYPE).at[:, :CLS_NUM].set(wc)
    params["bc"] = jnp.zeros((1, CLS_PAD), DTYPE)
    return params


# ---------------- forward (EmoModel.forward equivalent) ----------------
def emo_model_forward(params, batch_input_ids, batch_attention_mask):
    """batch_input_ids, batch_attention_mask: (batch, seq) int -> (batch, clsNum)."""
    B, S = batch_input_ids.shape
    ids3 = batch_input_ids.astype(jnp.int32).reshape(B, S, 1)
    mask3 = batch_attention_mask.astype(DTYPE).reshape(B, 1, S)
    pos = params["pos_emb"][:S]                         # (S, H)

    def _zeros_index_map(ndim):
        def im(b):
            return (0,) * ndim
        return im

    def full_spec(shape):
        return pl.BlockSpec(shape, _zeros_index_map(len(shape)))

    in_specs = [
        pl.BlockSpec((1, S, 1), lambda b: (b, 0, 0)),   # ids (per-batch block)
        pl.BlockSpec((1, 1, S), lambda b: (b, 0, 0)),   # mask (per-batch block)
        full_spec((VOCAB, HIDDEN)),                     # word_emb (VMEM-resident)
        full_spec((S, HIDDEN)),                         # pos_emb[:S]
        full_spec((1, HIDDEN)),                         # type row
        full_spec((1, HIDDEN)),                         # emb LN gamma
        full_spec((1, HIDDEN)),                         # emb LN beta
        full_spec((N_LAYERS, HIDDEN, 3 * HIDDEN)),      # fused QKV weights
        full_spec((N_LAYERS, 1, 3 * HIDDEN)),           # fused QKV biases
        full_spec((N_LAYERS, HIDDEN, HIDDEN)),          # Wo
        full_spec((N_LAYERS, 1, HIDDEN)),               # bo
        full_spec((N_LAYERS, 1, HIDDEN)),               # ln1 gamma
        full_spec((N_LAYERS, 1, HIDDEN)),               # ln1 beta
        full_spec((N_LAYERS, HIDDEN, FFN)),             # W1
        full_spec((N_LAYERS, 1, FFN)),                  # b1
        full_spec((N_LAYERS, FFN, HIDDEN)),             # W2
        full_spec((N_LAYERS, 1, HIDDEN)),               # b2
        full_spec((N_LAYERS, 1, HIDDEN)),               # ln2 gamma
        full_spec((N_LAYERS, 1, HIDDEN)),               # ln2 beta
        full_spec((HIDDEN, CLS_PAD)),                   # Wc (lane-padded)
        full_spec((1, CLS_PAD)),                        # bc (lane-padded)
    ]

    out = pl.pallas_call(
        _encoder_kernel,
        out_shape=jax.ShapeDtypeStruct((B, 1, CLS_PAD), DTYPE),
        grid=(B,),
        in_specs=in_specs,
        out_specs=pl.BlockSpec((1, 1, CLS_PAD), lambda b: (b, 0, 0)),
        compiler_params=pltpu.CompilerParams(
            dimension_semantics=("parallel",)),         # both TCs on v7x get work
    )(
        ids3, mask3,
        params["word_emb"], pos, params["type_row"],
        params["emb_ln_g"], params["emb_ln_b"],
        params["wqkv"], params["bqkv"], params["wo"], params["bo"],
        params["ln1_g"], params["ln1_b"],
        params["w1"], params["b1"], params["w2"], params["b2"],
        params["ln2_g"], params["ln2_b"],
        params["wc"], params["bc"],
    )
    return out[:, 0, :CLS_NUM]


# ---------------- main ----------------
if __name__ == "__main__":
    B, S = 2, 8
    key = jax.random.PRNGKey(0)
    kp, kids = jax.random.split(key)

    params = init_params(kp)
    batch_input_ids = jax.random.randint(kids, (B, S), 0, VOCAB, dtype=jnp.int32)
    batch_attention_mask = jnp.ones((B, S), dtype=jnp.int32)
    # pad the tail of the second example to exercise the attention mask
    batch_attention_mask = batch_attention_mask.at[1, S - 2:].set(0)

    fwd = jax.jit(emo_model_forward)
    cls_outs = fwd(params, batch_input_ids, batch_attention_mask)
    jax.block_until_ready(cls_outs)

    assert cls_outs.shape == (B, CLS_NUM)
    assert bool(jnp.all(jnp.isfinite(cls_outs)))
    print("KERNEL_OK")
</pallas_src>

<mosaic_0001>
module attributes {stable_mosaic.version = 11 : i64} {
  func.func @_encoder_kernel(%arg0: i32, %arg1: memref<1x8x1xi32, #tpu.memory_space<vmem>>, %arg2: memref<1x1x8xf32, #tpu.memory_space<vmem>>, %arg3: memref<128x32xf32, #tpu.memory_space<vmem>>, %arg4: memref<8x32xf32, #tpu.memory_space<vmem>>, %arg5: memref<1x32xf32, #tpu.memory_space<vmem>>, %arg6: memref<1x32xf32, #tpu.memory_space<vmem>>, %arg7: memref<1x32xf32, #tpu.memory_space<vmem>>, %arg8: memref<2x32x96xf32, #tpu.memory_space<vmem>>, %arg9: memref<2x1x96xf32, #tpu.memory_space<vmem>>, %arg10: memref<2x32x32xf32, #tpu.memory_space<vmem>>, %arg11: memref<2x1x32xf32, #tpu.memory_space<vmem>>, %arg12: memref<2x1x32xf32, #tpu.memory_space<vmem>>, %arg13: memref<2x1x32xf32, #tpu.memory_space<vmem>>, %arg14: memref<2x32x64xf32, #tpu.memory_space<vmem>>, %arg15: memref<2x1x64xf32, #tpu.memory_space<vmem>>, %arg16: memref<2x64x32xf32, #tpu.memory_space<vmem>>, %arg17: memref<2x1x32xf32, #tpu.memory_space<vmem>>, %arg18: memref<2x1x32xf32, #tpu.memory_space<vmem>>, %arg19: memref<2x1x32xf32, #tpu.memory_space<vmem>>, %arg20: memref<32x128xf32, #tpu.memory_space<vmem>>, %arg21: memref<1x128xf32, #tpu.memory_space<vmem>>, %arg22: memref<1x1x128xf32, #tpu.memory_space<vmem>>) attributes {dimension_semantics = [#tpu.dimension_semantics<parallel>], iteration_bounds = array<i64: 2>, scalar_prefetch = 0 : i64, scratch_operands = 0 : i64, tpu.core_type = #tpu.core_type<tc>, window_params = [{transform_indices = @transform_0, window_bounds = array<i64: 1, 8, 1>}, {transform_indices = @transform_1, window_bounds = array<i64: 1, 1, 8>}, {pipeline_mode = #tpu.pipeline_mode<synchronous>, transform_indices = @transform_2, window_bounds = array<i64: 128, 32>}, {pipeline_mode = #tpu.pipeline_mode<synchronous>, transform_indices = @transform_3, window_bounds = array<i64: 8, 32>}, {pipeline_mode = #tpu.pipeline_mode<synchronous>, transform_indices = @transform_4, window_bounds = array<i64: 1, 32>}, {pipeline_mode = #tpu.pipeline_mode<synchronous>, transform_indices = @transform_5, window_bounds = array<i64: 1, 32>}, {pipeline_mode = #tpu.pipeline_mode<synchronous>, transform_indices = @transform_6, window_bounds = array<i64: 1, 32>}, {pipeline_mode = #tpu.pipeline_mode<synchronous>, transform_indices = @transform_7, window_bounds = array<i64: 2, 32, 96>}, {pipeline_mode = #tpu.pipeline_mode<synchronous>, transform_indices = @transform_8, window_bounds = array<i64: 2, 1, 96>}, {pipeline_mode = #tpu.pipeline_mode<synchronous>, transform_indices = @transform_9, window_bounds = array<i64: 2, 32, 32>}, {pipeline_mode = #tpu.pipeline_mode<synchronous>, transform_indices = @transform_10, window_bounds = array<i64: 2, 1, 32>}, {pipeline_mode = #tpu.pipeline_mode<synchronous>, transform_indices = @transform_11, window_bounds = array<i64: 2, 1, 32>}, {pipeline_mode = #tpu.pipeline_mode<synchronous>, transform_indices = @transform_12, window_bounds = array<i64: 2, 1, 32>}, {pipeline_mode = #tpu.pipeline_mode<synchronous>, transform_indices = @transform_13, window_bounds = array<i64: 2, 32, 64>}, {pipeline_mode = #tpu.pipeline_mode<synchronous>, transform_indices = @transform_14, window_bounds = array<i64: 2, 1, 64>}, {pipeline_mode = #tpu.pipeline_mode<synchronous>, transform_indices = @transform_15, window_bounds = array<i64: 2, 64, 32>}, {pipeline_mode = #tpu.pipeline_mode<synchronous>, transform_indices = @transform_16, window_bounds = array<i64: 2, 1, 32>}, {pipeline_mode = #tpu.pipeline_mode<synchronous>, transform_indices = @transform_17, window_bounds = array<i64: 2, 1, 32>}, {pipeline_mode = #tpu.pipeline_mode<synchronous>, transform_indices = @transform_18, window_bounds = array<i64: 2, 1, 32>}, {pipeline_mode = #tpu.pipeline_mode<synchronous>, transform_indices = @transform_19, window_bounds = array<i64: 32, 128>}, {pipeline_mode = #tpu.pipeline_mode<synchronous>, transform_indices = @transform_20, window_bounds = array<i64: 1, 128>}, {transform_indices = @transform_21, window_bounds = array<i64: 1, 1, 128>}]} {
    %c0 = arith.constant 0 : index
    %c0_0 = arith.constant 0 : index
    %c0_1 = arith.constant 0 : index
    %0 = vector.load %arg1[%c0, %c0_0, %c0_1] : memref<1x8x1xi32, #tpu.memory_space<vmem>>, vector<1x8x1xi32>
    %1 = vector.shape_cast %0 : vector<1x8x1xi32> to vector<8x1xi32>
    %2 = tpu.iota {dimensions = array<i32: 1>} : vector<8x128xi32>
    %3 = vector.broadcast %1 : vector<8x1xi32> to vector<8x128xi32>
    %4 = arith.cmpi eq, %2, %3 : vector<8x128xi32>
    %5 = arith.extui %4 : vector<8x128xi1> to vector<8x128xi32>
    %6 = arith.sitofp %5 : vector<8x128xi32> to vector<8x128xf32>
    %c0_2 = arith.constant 0 : index
    %c0_3 = arith.constant 0 : index
    %7 = vector.load %arg3[%c0_2, %c0_3] : memref<128x32xf32, #tpu.memory_space<vmem>>, vector<128x32xf32>
    %cst = arith.constant dense<0.000000e+00> : vector<8x32xf32>
    %8 = tpu.matmul %6, %7, %cst {dimension_numbers = #tpu.dot_dimension_numbers<[1], [0], [0], [1], [0, 0, 1, 1], [], []>} : vector<8x128xf32>, vector<128x32xf32>, vector<8x32xf32> -> vector<8x32xf32>
    %c0_4 = arith.constant 0 : index
    %c0_5 = arith.constant 0 : index
    %9 = vector.load %arg4[%c0_4, %c0_5] : memref<8x32xf32, #tpu.memory_space<vmem>>, vector<8x32xf32>
    %10 = arith.addf %8, %9 : vector<8x32xf32>
    %c0_6 = arith.constant 0 : index
    %c0_7 = arith.constant 0 : index
    %11 = vector.load %arg5[%c0_6, %c0_7] : memref<1x32xf32, #tpu.memory_space<vmem>>, vector<1x32xf32>
    %12 = vector.broadcast %11 : vector<1x32xf32> to vector<8x32xf32>
    %13 = arith.addf %10, %12 : vector<8x32xf32>
    %c0_8 = arith.constant 0 : index
    %c0_9 = arith.constant 0 : index
    %14 = vector.load %arg6[%c0_8, %c0_9] : memref<1x32xf32, #tpu.memory_space<vmem>>, vector<1x32xf32>
    %c0_10 = arith.constant 0 : index
    %c0_11 = arith.constant 0 : index
    %15 = vector.load %arg7[%c0_10, %c0_11] : memref<1x32xf32, #tpu.memory_space<vmem>>, vector<1x32xf32>
    %cst_12 = arith.constant dense<0.000000e+00> : vector<8xf32>
    %16 = vector.multi_reduction <add>, %13, %cst_12 [1] : vector<8x32xf32> to vector<8xf32>
    %17 = vector.shape_cast %16 : vector<8xf32> to vector<8x1xf32>
    %cst_13 = arith.constant 3.200000e+01 : f32
    %18 = vector.broadcast %cst_13 : f32 to vector<8x1xf32>
    %19 = arith.divf %17, %18 : vector<8x1xf32>
    %20 = vector.broadcast %19 : vector<8x1xf32> to vector<8x32xf32>
    %21 = arith.subf %13, %20 : vector<8x32xf32>
    %22 = arith.mulf %21, %21 : vector<8x32xf32>
    %cst_14 = arith.constant dense<0.000000e+00> : vector<8xf32>
    %23 = vector.multi_reduction <add>, %22, %cst_14 [1] : vector<8x32xf32> to vector<8xf32>
    %24 = vector.shape_cast %23 : vector<8xf32> to vector<8x1xf32>
    %cst_15 = arith.constant 3.200000e+01 : f32
    %25 = vector.broadcast %cst_15 : f32 to vector<8x1xf32>
    %26 = arith.divf %24, %25 : vector<8x1xf32>
    %cst_16 = arith.constant 9.99999996E-13 : f32
    %27 = vector.broadcast %cst_16 : f32 to vector<8x1xf32>
    %28 = arith.addf %26, %27 : vector<8x1xf32>
    %29 = math.rsqrt %28 : vector<8x1xf32>
    %30 = vector.broadcast %29 : vector<8x1xf32> to vector<8x32xf32>
    %31 = arith.mulf %21, %30 : vector<8x32xf32>
    %32 = vector.broadcast %14 : vector<1x32xf32> to vector<8x32xf32>
    %33 = arith.mulf %31, %32 : vector<8x32xf32>
    %34 = vector.broadcast %15 : vector<1x32xf32> to vector<8x32xf32>
    %35 = arith.addf %33, %34 : vector<8x32xf32>
    %c0_17 = arith.constant 0 : index
    %c0_18 = arith.constant 0 : index
    %c0_19 = arith.constant 0 : index
    %36 = vector.load %arg2[%c0_17, %c0_18, %c0_19] : memref<1x1x8xf32, #tpu.memory_space<vmem>>, vector<1x1x8xf32>
    %37 = vector.shape_cast %36 : vector<1x1x8xf32> to vector<1x8xf32>
    %cst_20 = arith.constant 1.000000e+00 : f32
    %38 = vector.broadcast %cst_20 : f32 to vector<1x8xf32>
    %39 = arith.subf %38, %37 : vector<1x8xf32>
    %cst_21 = arith.constant -1.000000e+09 : f32
    %40 = vector.broadcast %cst_21 : f32 to vector<1x8xf32>
    %41 = arith.mulf %39, %40 : vector<1x8xf32>
    %c0_22 = arith.constant 0 : index
    %c0_23 = arith.constant 0 : index
    %c0_24 = arith.constant 0 : index
    %42 = vector.load %arg8[%c0_22, %c0_23, %c0_24] : memref<2x32x96xf32, #tpu.memory_space<vmem>>, vector<1x32x96xf32>
    %43 = vector.shape_cast %42 : vector<1x32x96xf32> to vector<32x96xf32>
    %cst_25 = arith.constant dense<0.000000e+00> : vector<8x96xf32>
    %44 = tpu.matmul %35, %43, %cst_25 {dimension_numbers = #tpu.dot_dimension_numbers<[1], [0], [0], [1], [0, 0, 1, 1], [], []>} : vector<8x32xf32>, vector<32x96xf32>, vector<8x96xf32> -> vector<8x96xf32>
    %c0_26 = arith.constant 0 : index
    %c0_27 = arith.constant 0 : index
    %c0_28 = arith.constant 0 : index
    %45 = vector.load %arg9[%c0_26, %c0_27, %c0_28] : memref<2x1x96xf32, #tpu.memory_space<vmem>>, vector<1x1x96xf32>
    %46 = vector.shape_cast %45 : vector<1x1x96xf32> to vector<1x96xf32>
    %47 = vector.broadcast %46 : vector<1x96xf32> to vector<8x96xf32>
    %48 = arith.addf %44, %47 : vector<8x96xf32>
    %c0_29 = arith.constant 0 : index
    %c0_30 = arith.constant 0 : index
    %c0_31 = arith.constant 0 : index
    %49 = vector.load %arg10[%c0_29, %c0_30, %c0_31] : memref<2x32x32xf32, #tpu.memory_space<vmem>>, vector<1x32x32xf32>
    %50 = vector.shape_cast %49 : vector<1x32x32xf32> to vector<32x32xf32>
    %51 = vector.extract_strided_slice %48 {offsets = [0, 0], sizes = [8, 16], strides = [1, 1]} : vector<8x96xf32> to vector<8x16xf32>
    %52 = vector.extract_strided_slice %48 {offsets = [0, 32], sizes = [8, 16], strides = [1, 1]} : vector<8x96xf32> to vector<8x16xf32>
    %53 = vector.extract_strided_slice %48 {offsets = [0, 64], sizes = [8, 16], strides = [1, 1]} : vector<8x96xf32> to vector<8x16xf32>
    %cst_32 = arith.constant dense<0.000000e+00> : vector<8x8xf32>
    %54 = tpu.matmul %51, %52, %cst_32 {dimension_numbers = #tpu.dot_dimension_numbers<[1], [1], [0], [0], [0, 0, 1, 0], [], []>} : vector<8x16xf32>, vector<8x16xf32>, vector<8x8xf32> -> vector<8x8xf32>
    %cst_33 = arith.constant 2.500000e-01 : f32
    %55 = vector.broadcast %cst_33 : f32 to vector<8x8xf32>
    %56 = arith.mulf %54, %55 : vector<8x8xf32>
    %57 = vector.broadcast %41 : vector<1x8xf32> to vector<8x8xf32>
    %58 = arith.addf %56, %57 : vector<8x8xf32>
    %cst_34 = arith.constant dense<0xFF800000> : vector<8xf32>
    %59 = vector.multi_reduction <maximumf>, %58, %cst_34 [1] : vector<8x8xf32> to vector<8xf32>
    %60 = vector.shape_cast %59 : vector<8xf32> to vector<8x1xf32>
    %61 = vector.broadcast %60 : vector<8x1xf32> to vector<8x8xf32>
    %62 = arith.subf %58, %61 : vector<8x8xf32>
    %63 = math.exp %62 : vector<8x8xf32>
    %cst_35 = arith.constant dense<0.000000e+00> : vector<8xf32>
    %64 = vector.multi_reduction <add>, %63, %cst_35 [1] : vector<8x8xf32> to vector<8xf32>
    %65 = vector.shape_cast %64 : vector<8xf32> to vector<8x1xf32>
    %66 = tpu.reciprocal %65 {approx = true} : vector<8x1xf32> -> vector<8x1xf32>
    %67 = vector.broadcast %66 : vector<8x1xf32> to vector<8x8xf32>
    %68 = arith.mulf %63, %67 : vector<8x8xf32>
    %cst_36 = arith.constant dense<0.000000e+00> : vector<8x16xf32>
    %69 = tpu.matmul %68, %53, %cst_36 {dimension_numbers = #tpu.dot_dimension_numbers<[1], [0], [0], [1], [0, 0, 1, 1], [], []>} : vector<8x8xf32>, vector<8x16xf32>, vector<8x16xf32> -> vector<8x16xf32>
    %70 = vector.extract_strided_slice %50 {offsets = [0, 0], sizes = [16, 32], strides = [1, 1]} : vector<32x32xf32> to vector<16x32xf32>
    %cst_37 = arith.constant dense<0.000000e+00> : vector<8x32xf32>
    %71 = tpu.matmul %69, %70, %cst_37 {dimension_numbers = #tpu.dot_dimension_numbers<[1], [0], [0], [1], [0, 0, 1, 1], [], []>} : vector<8x16xf32>, vector<16x32xf32>, vector<8x32xf32> -> vector<8x32xf32>
    %72 = vector.extract_strided_slice %48 {offsets = [0, 16], sizes = [8, 16], strides = [1, 1]} : vector<8x96xf32> to vector<8x16xf32>
    %73 = vector.extract_strided_slice %48 {offsets = [0, 48], sizes = [8, 16], strides = [1, 1]} : vector<8x96xf32> to vector<8x16xf32>
    %74 = vector.extract_strided_slice %48 {offsets = [0, 80], sizes = [8, 16], strides = [1, 1]} : vector<8x96xf32> to vector<8x16xf32>
    %cst_38 = arith.constant dense<0.000000e+00> : vector<8x8xf32>
    %75 = tpu.matmul %72, %73, %cst_38 {dimension_numbers = #tpu.dot_dimension_numbers<[1], [1], [0], [0], [0, 0, 1, 0], [], []>} : vector<8x16xf32>, vector<8x16xf32>, vector<8x8xf32> -> vector<8x8xf32>
    %cst_39 = arith.constant 2.500000e-01 : f32
    %76 = vector.broadcast %cst_39 : f32 to vector<8x8xf32>
    %77 = arith.mulf %75, %76 : vector<8x8xf32>
    %78 = vector.broadcast %41 : vector<1x8xf32> to vector<8x8xf32>
    %79 = arith.addf %77, %78 : vector<8x8xf32>
    %cst_40 = arith.constant dense<0xFF800000> : vector<8xf32>
    %80 = vector.multi_reduction <maximumf>, %79, %cst_40 [1] : vector<8x8xf32> to vector<8xf32>
    %81 = vector.shape_cast %80 : vector<8xf32> to vector<8x1xf32>
    %82 = vector.broadcast %81 : vector<8x1xf32> to vector<8x8xf32>
    %83 = arith.subf %79, %82 : vector<8x8xf32>
    %84 = math.exp %83 : vector<8x8xf32>
    %cst_41 = arith.constant dense<0.000000e+00> : vector<8xf32>
    %85 = vector.multi_reduction <add>, %84, %cst_41 [1] : vector<8x8xf32> to vector<8xf32>
    %86 = vector.shape_cast %85 : vector<8xf32> to vector<8x1xf32>
    %87 = tpu.reciprocal %86 {approx = true} : vector<8x1xf32> -> vector<8x1xf32>
    %88 = vector.broadcast %87 : vector<8x1xf32> to vector<8x8xf32>
    %89 = arith.mulf %84, %88 : vector<8x8xf32>
    %cst_42 = arith.constant dense<0.000000e+00> : vector<8x16xf32>
    %90 = tpu.matmul %89, %74, %cst_42 {dimension_numbers = #tpu.dot_dimension_numbers<[1], [0], [0], [1], [0, 0, 1, 1], [], []>} : vector<8x8xf32>, vector<8x16xf32>, vector<8x16xf32> -> vector<8x16xf32>
    %91 = vector.extract_strided_slice %50 {offsets = [16, 0], sizes = [16, 32], strides = [1, 1]} : vector<32x32xf32> to vector<16x32xf32>
    %cst_43 = arith.constant dense<0.000000e+00> : vector<8x32xf32>
    %92 = tpu.matmul %90, %91, %cst_43 {dimension_numbers = #tpu.dot_dimension_numbers<[1], [0], [0], [1], [0, 0, 1, 1], [], []>} : vector<8x16xf32>, vector<16x32xf32>, vector<8x32xf32> -> vector<8x32xf32>
    %93 = arith.addf %71, %92 : vector<8x32xf32>
    %c0_44 = arith.constant 0 : index
    %c0_45 = arith.constant 0 : index
    %c0_46 = arith.constant 0 : index
    %94 = vector.load %arg11[%c0_44, %c0_45, %c0_46] : memref<2x1x32xf32, #tpu.memory_space<vmem>>, vector<1x1x32xf32>
    %95 = vector.shape_cast %94 : vector<1x1x32xf32> to vector<1x32xf32>
    %96 = vector.broadcast %95 : vector<1x32xf32> to vector<8x32xf32>
    %97 = arith.addf %93, %96 : vector<8x32xf32>
    %98 = arith.addf %35, %97 : vector<8x32xf32>
    %c0_47 = arith.constant 0 : index
    %c0_48 = arith.constant 0 : index
    %c0_49 = arith.constant 0 : index
    %99 = vector.load %arg12[%c0_47, %c0_48, %c0_49] : memref<2x1x32xf32, #tpu.memory_space<vmem>>, vector<1x1x32xf32>
    %100 = vector.shape_cast %99 : vector<1x1x32xf32> to vector<1x32xf32>
    %c0_50 = arith.constant 0 : index
    %c0_51 = arith.constant 0 : index
    %c0_52 = arith.constant 0 : index
    %101 = vector.load %arg13[%c0_50, %c0_51, %c0_52] : memref<2x1x32xf32, #tpu.memory_space<vmem>>, vector<1x1x32xf32>
    %102 = vector.shape_cast %101 : vector<1x1x32xf32> to vector<1x32xf32>
    %cst_53 = arith.constant dense<0.000000e+00> : vector<8xf32>
    %103 = vector.multi_reduction <add>, %98, %cst_53 [1] : vector<8x32xf32> to vector<8xf32>
    %104 = vector.shape_cast %103 : vector<8xf32> to vector<8x1xf32>
    %cst_54 = arith.constant 3.200000e+01 : f32
    %105 = vector.broadcast %cst_54 : f32 to vector<8x1xf32>
    %106 = arith.divf %104, %105 : vector<8x1xf32>
    %107 = vector.broadcast %106 : vector<8x1xf32> to vector<8x32xf32>
    %108 = arith.subf %98, %107 : vector<8x32xf32>
    %109 = arith.mulf %108, %108 : vector<8x32xf32>
    %cst_55 = arith.constant dense<0.000000e+00> : vector<8xf32>
    %110 = vector.multi_reduction <add>, %109, %cst_55 [1] : vector<8x32xf32> to vector<8xf32>
    %111 = vector.shape_cast %110 : vector<8xf32> to vector<8x1xf32>
    %cst_56 = arith.constant 3.200000e+01 : f32
    %112 = vector.broadcast %cst_56 : f32 to vector<8x1xf32>
    %113 = arith.divf %111, %112 : vector<8x1xf32>
    %cst_57 = arith.constant 9.99999996E-13 : f32
    %114 = vector.broadcast %cst_57 : f32 to vector<8x1xf32>
    %115 = arith.addf %113, %114 : vector<8x1xf32>
    %116 = math.rsqrt %115 : vector<8x1xf32>
    %117 = vector.broadcast %116 : vector<8x1xf32> to vector<8x32xf32>
    %118 = arith.mulf %108, %117 : vector<8x32xf32>
    %119 = vector.broadcast %100 : vector<1x32xf32> to vector<8x32xf32>
    %120 = arith.mulf %118, %119 : vector<8x32xf32>
    %121 = vector.broadcast %102 : vector<1x32xf32> to vector<8x32xf32>
    %122 = arith.addf %120, %121 : vector<8x32xf32>
    %c0_58 = arith.constant 0 : index
    %c0_59 = arith.constant 0 : index
    %c0_60 = arith.constant 0 : index
    %123 = vector.load %arg14[%c0_58, %c0_59, %c0_60] : memref<2x32x64xf32, #tpu.memory_space<vmem>>, vector<1x32x64xf32>
    %124 = vector.shape_cast %123 : vector<1x32x64xf32> to vector<32x64xf32>
    %cst_61 = arith.constant dense<0.000000e+00> : vector<8x64xf32>
    %125 = tpu.matmul %122, %124, %cst_61 {dimension_numbers = #tpu.dot_dimension_numbers<[1], [0], [0], [1], [0, 0, 1, 1], [], []>} : vector<8x32xf32>, vector<32x64xf32>, vector<8x64xf32> -> vector<8x64xf32>
    %c0_62 = arith.constant 0 : index
    %c0_63 = arith.constant 0 : index
    %c0_64 = arith.constant 0 : index
    %126 = vector.load %arg15[%c0_62, %c0_63, %c0_64] : memref<2x1x64xf32, #tpu.memory_space<vmem>>, vector<1x1x64xf32>
    %127 = vector.shape_cast %126 : vector<1x1x64xf32> to vector<1x64xf32>
    %128 = vector.broadcast %127 : vector<1x64xf32> to vector<8x64xf32>
    %129 = arith.addf %125, %128 : vector<8x64xf32>
    %130 = arith.mulf %129, %129 : vector<8x64xf32>
    %131 = arith.mulf %129, %130 : vector<8x64xf32>
    %cst_65 = arith.constant 4.471500e-02 : f32
    %132 = vector.broadcast %cst_65 : f32 to vector<8x64xf32>
    %133 = arith.mulf %132, %131 : vector<8x64xf32>
    %134 = arith.addf %129, %133 : vector<8x64xf32>
    %cst_66 = arith.constant 0.797884583 : f32
    %135 = vector.broadcast %cst_66 : f32 to vector<8x64xf32>
    %136 = arith.mulf %135, %134 : vector<8x64xf32>
    %137 = math.tanh %136 : vector<8x64xf32>
    %cst_67 = arith.constant 1.000000e+00 : f32
    %138 = vector.broadcast %cst_67 : f32 to vector<8x64xf32>
    %139 = arith.addf %138, %137 : vector<8x64xf32>
    %cst_68 = arith.constant 5.000000e-01 : f32
    %140 = vector.broadcast %cst_68 : f32 to vector<8x64xf32>
    %141 = arith.mulf %140, %139 : vector<8x64xf32>
    %142 = arith.mulf %129, %141 : vector<8x64xf32>
    %c0_69 = arith.constant 0 : index
    %c0_70 = arith.constant 0 : index
    %c0_71 = arith.constant 0 : index
    %143 = vector.load %arg16[%c0_69, %c0_70, %c0_71] : memref<2x64x32xf32, #tpu.memory_space<vmem>>, vector<1x64x32xf32>
    %144 = vector.shape_cast %143 : vector<1x64x32xf32> to vector<64x32xf32>
    %cst_72 = arith.constant dense<0.000000e+00> : vector<8x32xf32>
    %145 = tpu.matmul %142, %144, %cst_72 {dimension_numbers = #tpu.dot_dimension_numbers<[1], [0], [0], [1], [0, 0, 1, 1], [], []>} : vector<8x64xf32>, vector<64x32xf32>, vector<8x32xf32> -> vector<8x32xf32>
    %c0_73 = arith.constant 0 : index
    %c0_74 = arith.constant 0 : index
    %c0_75 = arith.constant 0 : index
    %146 = vector.load %arg17[%c0_73, %c0_74, %c0_75] : memref<2x1x32xf32, #tpu.memory_space<vmem>>, vector<1x1x32xf32>
    %147 = vector.shape_cast %146 : vector<1x1x32xf32> to vector<1x32xf32>
    %148 = vector.broadcast %147 : vector<1x32xf32> to vector<8x32xf32>
    %149 = arith.addf %145, %148 : vector<8x32xf32>
    %150 = arith.addf %122, %149 : vector<8x32xf32>
    %c0_76 = arith.constant 0 : index
    %c0_77 = arith.constant 0 : index
    %c0_78 = arith.constant 0 : index
    %151 = vector.load %arg18[%c0_76, %c0_77, %c0_78] : memref<2x1x32xf32, #tpu.memory_space<vmem>>, vector<1x1x32xf32>
    %152 = vector.shape_cast %151 : vector<1x1x32xf32> to vector<1x32xf32>
    %c0_79 = arith.constant 0 : index
    %c0_80 = arith.constant 0 : index
    %c0_81 = arith.constant 0 : index
    %153 = vector.load %arg19[%c0_79, %c0_80, %c0_81] : memref<2x1x32xf32, #tpu.memory_space<vmem>>, vector<1x1x32xf32>
    %154 = vector.shape_cast %153 : vector<1x1x32xf32> to vector<1x32xf32>
    %cst_82 = arith.constant dense<0.000000e+00> : vector<8xf32>
    %155 = vector.multi_reduction <add>, %150, %cst_82 [1] : vector<8x32xf32> to vector<8xf32>
    %156 = vector.shape_cast %155 : vector<8xf32> to vector<8x1xf32>
    %cst_83 = arith.constant 3.200000e+01 : f32
    %157 = vector.broadcast %cst_83 : f32 to vector<8x1xf32>
    %158 = arith.divf %156, %157 : vector<8x1xf32>
    %159 = vector.broadcast %158 : vector<8x1xf32> to vector<8x32xf32>
    %160 = arith.subf %150, %159 : vector<8x32xf32>
    %161 = arith.mulf %160, %160 : vector<8x32xf32>
    %cst_84 = arith.constant dense<0.000000e+00> : vector<8xf32>
    %162 = vector.multi_reduction <add>, %161, %cst_84 [1] : vector<8x32xf32> to vector<8xf32>
    %163 = vector.shape_cast %162 : vector<8xf32> to vector<8x1xf32>
    %cst_85 = arith.constant 3.200000e+01 : f32
    %164 = vector.broadcast %cst_85 : f32 to vector<8x1xf32>
    %165 = arith.divf %163, %164 : vector<8x1xf32>
    %cst_86 = arith.constant 9.99999996E-13 : f32
    %166 = vector.broadcast %cst_86 : f32 to vector<8x1xf32>
    %167 = arith.addf %165, %166 : vector<8x1xf32>
    %168 = math.rsqrt %167 : vector<8x1xf32>
    %169 = vector.broadcast %168 : vector<8x1xf32> to vector<8x32xf32>
    %170 = arith.mulf %160, %169 : vector<8x32xf32>
    %171 = vector.broadcast %152 : vector<1x32xf32> to vector<8x32xf32>
    %172 = arith.mulf %170, %171 : vector<8x32xf32>
    %173 = vector.broadcast %154 : vector<1x32xf32> to vector<8x32xf32>
    %174 = arith.addf %172, %173 : vector<8x32xf32>
    %c1 = arith.constant 1 : index
    %c0_87 = arith.constant 0 : index
    %c0_88 = arith.constant 0 : index
    %175 = vector.load %arg8[%c1, %c0_87, %c0_88] : memref<2x32x96xf32, #tpu.memory_space<vmem>>, vector<1x32x96xf32>
    %176 = vector.shape_cast %175 : vector<1x32x96xf32> to vector<32x96xf32>
    %cst_89 = arith.constant dense<0.000000e+00> : vector<8x96xf32>
    %177 = tpu.matmul %174, %176, %cst_89 {dimension_numbers = #tpu.dot_dimension_numbers<[1], [0], [0], [1], [0, 0, 1, 1], [], []>} : vector<8x32xf32>, vector<32x96xf32>, vector<8x96xf32> -> vector<8x96xf32>
    %c1_90 = arith.constant 1 : index
    %c0_91 = arith.constant 0 : index
    %c0_92 = arith.constant 0 : index
    %178 = vector.load %arg9[%c1_90, %c0_91, %c0_92] : memref<2x1x96xf32, #tpu.memory_space<vmem>>, vector<1x1x96xf32>
    %179 = vector.shape_cast %178 : vector<1x1x96xf32> to vector<1x96xf32>
    %180 = vector.broadcast %179 : vector<1x96xf32> to vector<8x96xf32>
    %181 = arith.addf %177, %180 : vector<8x96xf32>
    %c1_93 = arith.constant 1 : index
    %c0_94 = arith.constant 0 : index
    %c0_95 = arith.constant 0 : index
    %182 = vector.load %arg10[%c1_93, %c0_94, %c0_95] : memref<2x32x32xf32, #tpu.memory_space<vmem>>, vector<1x32x32xf32>
    %183 = vector.shape_cast %182 : vector<1x32x32xf32> to vector<32x32xf32>
    %184 = vector.extract_strided_slice %181 {offsets = [0, 0], sizes = [8, 16], strides = [1, 1]} : vector<8x96xf32> to vector<8x16xf32>
    %185 = vector.extract_strided_slice %181 {offsets = [0, 32], sizes = [8, 16], strides = [1, 1]} : vector<8x96xf32> to vector<8x16xf32>
    %186 = vector.extract_strided_slice %181 {offsets = [0, 64], sizes = [8, 16], strides = [1, 1]} : vector<8x96xf32> to vector<8x16xf32>
    %cst_96 = arith.constant dense<0.000000e+00> : vector<8x8xf32>
    %187 = tpu.matmul %184, %185, %cst_96 {dimension_numbers = #tpu.dot_dimension_numbers<[1], [1], [0], [0], [0, 0, 1, 0], [], []>} : vector<8x16xf32>, vector<8x16xf32>, vector<8x8xf32> -> vector<8x8xf32>
    %cst_97 = arith.constant 2.500000e-01 : f32
    %188 = vector.broadcast %cst_97 : f32 to vector<8x8xf32>
    %189 = arith.mulf %187, %188 : vector<8x8xf32>
    %190 = vector.broadcast %41 : vector<1x8xf32> to vector<8x8xf32>
    %191 = arith.addf %189, %190 : vector<8x8xf32>
    %cst_98 = arith.constant dense<0xFF800000> : vector<8xf32>
    %192 = vector.multi_reduction <maximumf>, %191, %cst_98 [1] : vector<8x8xf32> to vector<8xf32>
    %193 = vector.shape_cast %192 : vector<8xf32> to vector<8x1xf32>
    %194 = vector.broadcast %193 : vector<8x1xf32> to vector<8x8xf32>
    %195 = arith.subf %191, %194 : vector<8x8xf32>
    %196 = math.exp %195 : vector<8x8xf32>
    %cst_99 = arith.constant dense<0.000000e+00> : vector<8xf32>
    %197 = vector.multi_reduction <add>, %196, %cst_99 [1] : vector<8x8xf32> to vector<8xf32>
    %198 = vector.shape_cast %197 : vector<8xf32> to vector<8x1xf32>
    %199 = tpu.reciprocal %198 {approx = true} : vector<8x1xf32> -> vector<8x1xf32>
    %200 = vector.broadcast %199 : vector<8x1xf32> to vector<8x8xf32>
    %201 = arith.mulf %196, %200 : vector<8x8xf32>
    %cst_100 = arith.constant dense<0.000000e+00> : vector<8x16xf32>
    %202 = tpu.matmul %201, %186, %cst_100 {dimension_numbers = #tpu.dot_dimension_numbers<[1], [0], [0], [1], [0, 0, 1, 1], [], []>} : vector<8x8xf32>, vector<8x16xf32>, vector<8x16xf32> -> vector<8x16xf32>
    %203 = vector.extract_strided_slice %183 {offsets = [0, 0], sizes = [16, 32], strides = [1, 1]} : vector<32x32xf32> to vector<16x32xf32>
    %cst_101 = arith.constant dense<0.000000e+00> : vector<8x32xf32>
    %204 = tpu.matmul %202, %203, %cst_101 {dimension_numbers = #tpu.dot_dimension_numbers<[1], [0], [0], [1], [0, 0, 1, 1], [], []>} : vector<8x16xf32>, vector<16x32xf32>, vector<8x32xf32> -> vector<8x32xf32>
    %205 = vector.extract_strided_slice %181 {offsets = [0, 16], sizes = [8, 16], strides = [1, 1]} : vector<8x96xf32> to vector<8x16xf32>
    %206 = vector.extract_strided_slice %181 {offsets = [0, 48], sizes = [8, 16], strides = [1, 1]} : vector<8x96xf32> to vector<8x16xf32>
    %207 = vector.extract_strided_slice %181 {offsets = [0, 80], sizes = [8, 16], strides = [1, 1]} : vector<8x96xf32> to vector<8x16xf32>
    %cst_102 = arith.constant dense<0.000000e+00> : vector<8x8xf32>
    %208 = tpu.matmul %205, %206, %cst_102 {dimension_numbers = #tpu.dot_dimension_numbers<[1], [1], [0], [0], [0, 0, 1, 0], [], []>} : vector<8x16xf32>, vector<8x16xf32>, vector<8x8xf32> -> vector<8x8xf32>
    %cst_103 = arith.constant 2.500000e-01 : f32
    %209 = vector.broadcast %cst_103 : f32 to vector<8x8xf32>
    %210 = arith.mulf %208, %209 : vector<8x8xf32>
    %211 = vector.broadcast %41 : vector<1x8xf32> to vector<8x8xf32>
    %212 = arith.addf %210, %211 : vector<8x8xf32>
    %cst_104 = arith.constant dense<0xFF800000> : vector<8xf32>
    %213 = vector.multi_reduction <maximumf>, %212, %cst_104 [1] : vector<8x8xf32> to vector<8xf32>
    %214 = vector.shape_cast %213 : vector<8xf32> to vector<8x1xf32>
    %215 = vector.broadcast %214 : vector<8x1xf32> to vector<8x8xf32>
    %216 = arith.subf %212, %215 : vector<8x8xf32>
    %217 = math.exp %216 : vector<8x8xf32>
    %cst_105 = arith.constant dense<0.000000e+00> : vector<8xf32>
    %218 = vector.multi_reduction <add>, %217, %cst_105 [1] : vector<8x8xf32> to vector<8xf32>
    %219 = vector.shape_cast %218 : vector<8xf32> to vector<8x1xf32>
    %220 = tpu.reciprocal %219 {approx = true} : vector<8x1xf32> -> vector<8x1xf32>
    %221 = vector.broadcast %220 : vector<8x1xf32> to vector<8x8xf32>
    %222 = arith.mulf %217, %221 : vector<8x8xf32>
    %cst_106 = arith.constant dense<0.000000e+00> : vector<8x16xf32>
    %223 = tpu.matmul %222, %207, %cst_106 {dimension_numbers = #tpu.dot_dimension_numbers<[1], [0], [0], [1], [0, 0, 1, 1], [], []>} : vector<8x8xf32>, vector<8x16xf32>, vector<8x16xf32> -> vector<8x16xf32>
    %224 = vector.extract_strided_slice %183 {offsets = [16, 0], sizes = [16, 32], strides = [1, 1]} : vector<32x32xf32> to vector<16x32xf32>
    %cst_107 = arith.constant dense<0.000000e+00> : vector<8x32xf32>
    %225 = tpu.matmul %223, %224, %cst_107 {dimension_numbers = #tpu.dot_dimension_numbers<[1], [0], [0], [1], [0, 0, 1, 1], [], []>} : vector<8x16xf32>, vector<16x32xf32>, vector<8x32xf32> -> vector<8x32xf32>
    %226 = arith.addf %204, %225 : vector<8x32xf32>
    %c1_108 = arith.constant 1 : index
    %c0_109 = arith.constant 0 : index
    %c0_110 = arith.constant 0 : index
    %227 = vector.load %arg11[%c1_108, %c0_109, %c0_110] : memref<2x1x32xf32, #tpu.memory_space<vmem>>, vector<1x1x32xf32>
    %228 = vector.shape_cast %227 : vector<1x1x32xf32> to vector<1x32xf32>
    %229 = vector.broadcast %228 : vector<1x32xf32> to vector<8x32xf32>
    %230 = arith.addf %226, %229 : vector<8x32xf32>
    %231 = arith.addf %174, %230 : vector<8x32xf32>
    %c1_111 = arith.constant 1 : index
    %c0_112 = arith.constant 0 : index
    %c0_113 = arith.constant 0 : index
    %232 = vector.load %arg12[%c1_111, %c0_112, %c0_113] : memref<2x1x32xf32, #tpu.memory_space<vmem>>, vector<1x1x32xf32>
    %233 = vector.shape_cast %232 : vector<1x1x32xf32> to vector<1x32xf32>
    %c1_114 = arith.constant 1 : index
    %c0_115 = arith.constant 0 : index
    %c0_116 = arith.constant 0 : index
    %234 = vector.load %arg13[%c1_114, %c0_115, %c0_116] : memref<2x1x32xf32, #tpu.memory_space<vmem>>, vector<1x1x32xf32>
    %235 = vector.shape_cast %234 : vector<1x1x32xf32> to vector<1x32xf32>
    %cst_117 = arith.constant dense<0.000000e+00> : vector<8xf32>
    %236 = vector.multi_reduction <add>, %231, %cst_117 [1] : vector<8x32xf32> to vector<8xf32>
    %237 = vector.shape_cast %236 : vector<8xf32> to vector<8x1xf32>
    %cst_118 = arith.constant 3.200000e+01 : f32
    %238 = vector.broadcast %cst_118 : f32 to vector<8x1xf32>
    %239 = arith.divf %237, %238 : vector<8x1xf32>
    %240 = vector.broadcast %239 : vector<8x1xf32> to vector<8x32xf32>
    %241 = arith.subf %231, %240 : vector<8x32xf32>
    %242 = arith.mulf %241, %241 : vector<8x32xf32>
    %cst_119 = arith.constant dense<0.000000e+00> : vector<8xf32>
    %243 = vector.multi_reduction <add>, %242, %cst_119 [1] : vector<8x32xf32> to vector<8xf32>
    %244 = vector.shape_cast %243 : vector<8xf32> to vector<8x1xf32>
    %cst_120 = arith.constant 3.200000e+01 : f32
    %245 = vector.broadcast %cst_120 : f32 to vector<8x1xf32>
    %246 = arith.divf %244, %245 : vector<8x1xf32>
    %cst_121 = arith.constant 9.99999996E-13 : f32
    %247 = vector.broadcast %cst_121 : f32 to vector<8x1xf32>
    %248 = arith.addf %246, %247 : vector<8x1xf32>
    %249 = math.rsqrt %248 : vector<8x1xf32>
    %250 = vector.broadcast %249 : vector<8x1xf32> to vector<8x32xf32>
    %251 = arith.mulf %241, %250 : vector<8x32xf32>
    %252 = vector.broadcast %233 : vector<1x32xf32> to vector<8x32xf32>
    %253 = arith.mulf %251, %252 : vector<8x32xf32>
    %254 = vector.broadcast %235 : vector<1x32xf32> to vector<8x32xf32>
    %255 = arith.addf %253, %254 : vector<8x32xf32>
    %c1_122 = arith.constant 1 : index
    %c0_123 = arith.constant 0 : index
    %c0_124 = arith.constant 0 : index
    %256 = vector.load %arg14[%c1_122, %c0_123, %c0_124] : memref<2x32x64xf32, #tpu.memory_space<vmem>>, vector<1x32x64xf32>
    %257 = vector.shape_cast %256 : vector<1x32x64xf32> to vector<32x64xf32>
    %cst_125 = arith.constant dense<0.000000e+00> : vector<8x64xf32>
    %258 = tpu.matmul %255, %257, %cst_125 {dimension_numbers = #tpu.dot_dimension_numbers<[1], [0], [0], [1], [0, 0, 1, 1], [], []>} : vector<8x32xf32>, vector<32x64xf32>, vector<8x64xf32> -> vector<8x64xf32>
    %c1_126 = arith.constant 1 : index
    %c0_127 = arith.constant 0 : index
    %c0_128 = arith.constant 0 : index
    %259 = vector.load %arg15[%c1_126, %c0_127, %c0_128] : memref<2x1x64xf32, #tpu.memory_space<vmem>>, vector<1x1x64xf32>
    %260 = vector.shape_cast %259 : vector<1x1x64xf32> to vector<1x64xf32>
    %261 = vector.broadcast %260 : vector<1x64xf32> to vector<8x64xf32>
    %262 = arith.addf %258, %261 : vector<8x64xf32>
    %263 = arith.mulf %262, %262 : vector<8x64xf32>
    %264 = arith.mulf %262, %263 : vector<8x64xf32>
    %cst_129 = arith.constant 4.471500e-02 : f32
    %265 = vector.broadcast %cst_129 : f32 to vector<8x64xf32>
    %266 = arith.mulf %265, %264 : vector<8x64xf32>
    %267 = arith.addf %262, %266 : vector<8x64xf32>
    %cst_130 = arith.constant 0.797884583 : f32
    %268 = vector.broadcast %cst_130 : f32 to vector<8x64xf32>
    %269 = arith.mulf %268, %267 : vector<8x64xf32>
    %270 = math.tanh %269 : vector<8x64xf32>
    %cst_131 = arith.constant 1.000000e+00 : f32
    %271 = vector.broadcast %cst_131 : f32 to vector<8x64xf32>
    %272 = arith.addf %271, %270 : vector<8x64xf32>
    %cst_132 = arith.constant 5.000000e-01 : f32
    %273 = vector.broadcast %cst_132 : f32 to vector<8x64xf32>
    %274 = arith.mulf %273, %272 : vector<8x64xf32>
    %275 = arith.mulf %262, %274 : vector<8x64xf32>
    %c1_133 = arith.constant 1 : index
    %c0_134 = arith.constant 0 : index
    %c0_135 = arith.constant 0 : index
    %276 = vector.load %arg16[%c1_133, %c0_134, %c0_135] : memref<2x64x32xf32, #tpu.memory_space<vmem>>, vector<1x64x32xf32>
    %277 = vector.shape_cast %276 : vector<1x64x32xf32> to vector<64x32xf32>
    %cst_136 = arith.constant dense<0.000000e+00> : vector<8x32xf32>
    %278 = tpu.matmul %275, %277, %cst_136 {dimension_numbers = #tpu.dot_dimension_numbers<[1], [0], [0], [1], [0, 0, 1, 1], [], []>} : vector<8x64xf32>, vector<64x32xf32>, vector<8x32xf32> -> vector<8x32xf32>
    %c1_137 = arith.constant 1 : index
    %c0_138 = arith.constant 0 : index
    %c0_139 = arith.constant 0 : index
    %279 = vector.load %arg17[%c1_137, %c0_138, %c0_139] : memref<2x1x32xf32, #tpu.memory_space<vmem>>, vector<1x1x32xf32>
    %280 = vector.shape_cast %279 : vector<1x1x32xf32> to vector<1x32xf32>
    %281 = vector.broadcast %280 : vector<1x32xf32> to vector<8x32xf32>
    %282 = arith.addf %278, %281 : vector<8x32xf32>
    %283 = arith.addf %255, %282 : vector<8x32xf32>
    %c1_140 = arith.constant 1 : index
    %c0_141 = arith.constant 0 : index
    %c0_142 = arith.constant 0 : index
    %284 = vector.load %arg18[%c1_140, %c0_141, %c0_142] : memref<2x1x32xf32, #tpu.memory_space<vmem>>, vector<1x1x32xf32>
    %285 = vector.shape_cast %284 : vector<1x1x32xf32> to vector<1x32xf32>
    %c1_143 = arith.constant 1 : index
    %c0_144 = arith.constant 0 : index
    %c0_145 = arith.constant 0 : index
    %286 = vector.load %arg19[%c1_143, %c0_144, %c0_145] : memref<2x1x32xf32, #tpu.memory_space<vmem>>, vector<1x1x32xf32>
    %287 = vector.shape_cast %286 : vector<1x1x32xf32> to vector<1x32xf32>
    %cst_146 = arith.constant dense<0.000000e+00> : vector<8xf32>
    %288 = vector.multi_reduction <add>, %283, %cst_146 [1] : vector<8x32xf32> to vector<8xf32>
    %289 = vector.shape_cast %288 : vector<8xf32> to vector<8x1xf32>
    %cst_147 = arith.constant 3.200000e+01 : f32
    %290 = vector.broadcast %cst_147 : f32 to vector<8x1xf32>
    %291 = arith.divf %289, %290 : vector<8x1xf32>
    %292 = vector.broadcast %291 : vector<8x1xf32> to vector<8x32xf32>
    %293 = arith.subf %283, %292 : vector<8x32xf32>
    %294 = arith.mulf %293, %293 : vector<8x32xf32>
    %cst_148 = arith.constant dense<0.000000e+00> : vector<8xf32>
    %295 = vector.multi_reduction <add>, %294, %cst_148 [1] : vector<8x32xf32> to vector<8xf32>
    %296 = vector.shape_cast %295 : vector<8xf32> to vector<8x1xf32>
    %cst_149 = arith.constant 3.200000e+01 : f32
    %297 = vector.broadcast %cst_149 : f32 to vector<8x1xf32>
    %298 = arith.divf %296, %297 : vector<8x1xf32>
    %cst_150 = arith.constant 9.99999996E-13 : f32
    %299 = vector.broadcast %cst_150 : f32 to vector<8x1xf32>
    %300 = arith.addf %298, %299 : vector<8x1xf32>
    %301 = math.rsqrt %300 : vector<8x1xf32>
    %302 = vector.broadcast %301 : vector<8x1xf32> to vector<8x32xf32>
    %303 = arith.mulf %293, %302 : vector<8x32xf32>
    %304 = vector.broadcast %285 : vector<1x32xf32> to vector<8x32xf32>
    %305 = arith.mulf %303, %304 : vector<8x32xf32>
    %306 = vector.broadcast %287 : vector<1x32xf32> to vector<8x32xf32>
    %307 = arith.addf %305, %306 : vector<8x32xf32>
    %308 = vector.extract_strided_slice %307 {offsets = [0, 0], sizes = [1, 32], strides = [1, 1]} : vector<8x32xf32> to vector<1x32xf32>
    %c0_151 = arith.constant 0 : index
    %c0_152 = arith.constant 0 : index
    %309 = vector.load %arg20[%c0_151, %c0_152] : memref<32x128xf32, #tpu.memory_space<vmem>>, vector<32x128xf32>
    %cst_153 = arith.constant dense<0.000000e+00> : vector<1x128xf32>
    %310 = tpu.matmul %308, %309, %cst_153 {dimension_numbers = #tpu.dot_dimension_numbers<[1], [0], [0], [1], [0, 0, 1, 1], [], []>} : vector<1x32xf32>, vector<32x128xf32>, vector<1x128xf32> -> vector<1x128xf32>
    %c0_154 = arith.constant 0 : index
    %c0_155 = arith.constant 0 : index
    %311 = vector.load %arg21[%c0_154, %c0_155] : memref<1x128xf32, #tpu.memory_space<vmem>>, vector<1x128xf32>
    %312 = arith.addf %310, %311 : vector<1x128xf32>
    %313 = vector.shape_cast %312 : vector<1x128xf32> to vector<1x1x128xf32>
    %c0_156 = arith.constant 0 : index
    %c0_157 = arith.constant 0 : index
    %c0_158 = arith.constant 0 : index
    %314 = vector.load %arg22[%c0_156, %c0_157, %c0_158] : memref<1x1x128xf32, #tpu.memory_space<vmem>>, vector<1x1x128xf32>
    tpu.vector_store %arg22[%c0_156, %c0_157, %c0_158], %313 {strides = array<i32>} : memref<1x1x128xf32, #tpu.memory_space<vmem>>, vector<1x1x128xf32>,
    return
  }
  func.func @transform_0(%arg0: i32) -> (i32, i32, i32) {
    %c0_i32 = arith.constant 0 : i32
    %c0_i32_0 = arith.constant 0 : i32
    %c0_i32_1 = arith.constant 0 : i32
    return %arg0, %c0_i32, %c0_i32_0 : i32, i32, i32
  }
  func.func @transform_1(%arg0: i32) -> (i32, i32, i32) {
    %c0_i32 = arith.constant 0 : i32
    %c0_i32_0 = arith.constant 0 : i32
    %c0_i32_1 = arith.constant 0 : i32
    return %arg0, %c0_i32, %c0_i32_0 : i32, i32, i32
  }
  func.func @transform_2(%arg0: i32) -> (i32, i32) {
    %c0_i32 = arith.constant 0 : i32
    %c0_i32_0 = arith.constant 0 : i32
    %c0_i32_1 = arith.constant 0 : i32
    return %c0_i32, %c0_i32_0 : i32, i32
  }
  func.func @transform_3(%arg0: i32) -> (i32, i32) {
    %c0_i32 = arith.constant 0 : i32
    %c0_i32_0 = arith.constant 0 : i32
    %c0_i32_1 = arith.constant 0 : i32
    return %c0_i32, %c0_i32_0 : i32, i32
  }
  func.func @transform_4(%arg0: i32) -> (i32, i32) {
    %c0_i32 = arith.constant 0 : i32
    %c0_i32_0 = arith.constant 0 : i32
    %c0_i32_1 = arith.constant 0 : i32
    return %c0_i32, %c0_i32_0 : i32, i32
  }
  func.func @transform_5(%arg0: i32) -> (i32, i32) {
    %c0_i32 = arith.constant 0 : i32
    %c0_i32_0 = arith.constant 0 : i32
    %c0_i32_1 = arith.constant 0 : i32
    return %c0_i32, %c0_i32_0 : i32, i32
  }
  func.func @transform_6(%arg0: i32) -> (i32, i32) {
    %c0_i32 = arith.constant 0 : i32
    %c0_i32_0 = arith.constant 0 : i32
    %c0_i32_1 = arith.constant 0 : i32
    return %c0_i32, %c0_i32_0 : i32, i32
  }
  func.func @transform_7(%arg0: i32) -> (i32, i32, i32) {
    %c0_i32 = arith.constant 0 : i32
    %c0_i32_0 = arith.constant 0 : i32
    %c0_i32_1 = arith.constant 0 : i32
    %c0_i32_2 = arith.constant 0 : i32
    return %c0_i32, %c0_i32_0, %c0_i32_1 : i32, i32, i32
  }
  func.func @transform_8(%arg0: i32) -> (i32, i32, i32) {
    %c0_i32 = arith.constant 0 : i32
    %c0_i32_0 = arith.constant 0 : i32
    %c0_i32_1 = arith.constant 0 : i32
    %c0_i32_2 = arith.constant 0 : i32
    return %c0_i32, %c0_i32_0, %c0_i32_1 : i32, i32, i32
  }
  func.func @transform_9(%arg0: i32) -> (i32, i32, i32) {
    %c0_i32 = arith.constant 0 : i32
    %c0_i32_0 = arith.constant 0 : i32
    %c0_i32_1 = arith.constant 0 : i32
    %c0_i32_2 = arith.constant 0 : i32
    return %c0_i32, %c0_i32_0, %c0_i32_1 : i32, i32, i32
  }
  func.func @transform_10(%arg0: i32) -> (i32, i32, i32) {
    %c0_i32 = arith.constant 0 : i32
    %c0_i32_0 = arith.constant 0 : i32
    %c0_i32_1 = arith.constant 0 : i32
    %c0_i32_2 = arith.constant 0 : i32
    return %c0_i32, %c0_i32_0, %c0_i32_1 : i32, i32, i32
  }
  func.func @transform_11(%arg0: i32) -> (i32, i32, i32) {
    %c0_i32 = arith.constant 0 : i32
    %c0_i32_0 = arith.constant 0 : i32
    %c0_i32_1 = arith.constant 0 : i32
    %c0_i32_2 = arith.constant 0 : i32
    return %c0_i32, %c0_i32_0, %c0_i32_1 : i32, i32, i32
  }
  func.func @transform_12(%arg0: i32) -> (i32, i32, i32) {
    %c0_i32 = arith.constant 0 : i32
    %c0_i32_0 = arith.constant 0 : i32
    %c0_i32_1 = arith.constant 0 : i32
    %c0_i32_2 = arith.constant 0 : i32
    return %c0_i32, %c0_i32_0, %c0_i32_1 : i32, i32, i32
  }
  func.func @transform_13(%arg0: i32) -> (i32, i32, i32) {
    %c0_i32 = arith.constant 0 : i32
    %c0_i32_0 = arith.constant 0 : i32
    %c0_i32_1 = arith.constant 0 : i32
    %c0_i32_2 = arith.constant 0 : i32
    return %c0_i32, %c0_i32_0, %c0_i32_1 : i32, i32, i32
  }
  func.func @transform_14(%arg0: i32) -> (i32, i32, i32) {
    %c0_i32 = arith.constant 0 : i32
    %c0_i32_0 = arith.constant 0 : i32
    %c0_i32_1 = arith.constant 0 : i32
    %c0_i32_2 = arith.constant 0 : i32
    return %c0_i32, %c0_i32_0, %c0_i32_1 : i32, i32, i32
  }
  func.func @transform_15(%arg0: i32) -> (i32, i32, i32) {
    %c0_i32 = arith.constant 0 : i32
    %c0_i32_0 = arith.constant 0 : i32
    %c0_i32_1 = arith.constant 0 : i32
    %c0_i32_2 = arith.constant 0 : i32
    return %c0_i32, %c0_i32_0, %c0_i32_1 : i32, i32, i32
  }
  func.func @transform_16(%arg0: i32) -> (i32, i32, i32) {
    %c0_i32 = arith.constant 0 : i32
    %c0_i32_0 = arith.constant 0 : i32
    %c0_i32_1 = arith.constant 0 : i32
    %c0_i32_2 = arith.constant 0 : i32
    return %c0_i32, %c0_i32_0, %c0_i32_1 : i32, i32, i32
  }
  func.func @transform_17(%arg0: i32) -> (i32, i32, i32) {
    %c0_i32 = arith.constant 0 : i32
    %c0_i32_0 = arith.constant 0 : i32
    %c0_i32_1 = arith.constant 0 : i32
    %c0_i32_2 = arith.constant 0 : i32
    return %c0_i32, %c0_i32_0, %c0_i32_1 : i32, i32, i32
  }
  func.func @transform_18(%arg0: i32) -> (i32, i32, i32) {
    %c0_i32 = arith.constant 0 : i32
    %c0_i32_0 = arith.constant 0 : i32
    %c0_i32_1 = arith.constant 0 : i32
    %c0_i32_2 = arith.constant 0 : i32
    return %c0_i32, %c0_i32_0, %c0_i32_1 : i32, i32, i32
  }
  func.func @transform_19(%arg0: i32) -> (i32, i32) {
    %c0_i32 = arith.constant 0 : i32
    %c0_i32_0 = arith.constant 0 : i32
    %c0_i32_1 = arith.constant 0 : i32
    return %c0_i32, %c0_i32_0 : i32, i32
  }
  func.func @transform_20(%arg0: i32) -> (i32, i32) {
    %c0_i32 = arith.constant 0 : i32
    %c0_i32_0 = arith.constant 0 : i32
    %c0_i32_1 = arith.constant 0 : i32
    return %c0_i32, %c0_i32_0 : i32, i32
  }
  func.func @transform_21(%arg0: i32) -> (i32, i32, i32) {
    %c0_i32 = arith.constant 0 : i32
    %c0_i32_0 = arith.constant 0 : i32
    %c0_i32_1 = arith.constant 0 : i32
    return %arg0, %c0_i32, %c0_i32_0 : i32, i32, i32
  }
}

</mosaic_0001>

<bundles_post_ra>
// kernel: emo_model_forward.1
= control target key start
LH: loop header
LB: loop body
LE: loop exit
PB: predicated region body
PF: predicated region fallthrough
CT: control target
= control target key end

     0   :  { %s3751_s0 = inlined_call_operand.vmem [shape: s32[2,8,1], index: 0, kind: input, shape index: {}]   ;;  %s3752_s1 = inlined_call_operand.vmem [shape: f32[2,1,8], index: 1, kind: input, shape index: {}]   ;;  %s3753_s2 = inlined_call_operand.vmem [shape: f32[128,32], index: 2, kind: input, shape index: {}]   ;;  %s3754_s3 = inlined_call_operand.vmem [shape: f32[8,32], index: 3, kind: input, shape index: {}]   ;;  %s3755_s4 = inlined_call_operand.vmem [shape: f32[1,32], index: 4, kind: input, shape index: {}]   ;;  %s3756_s5 = inlined_call_operand.vmem [shape: f32[1,32], index: 5, kind: input, shape index: {}]   ;;  %s3757_s6 = inlined_call_operand.vmem [shape: f32[1,32], index: 6, kind: input, shape index: {}]   ;;  %s3758_s7 = inlined_call_operand.vmem [shape: f32[2,32,96], index: 7, kind: input, shape index: {}]   ;;  %s3759_s8 = inlined_call_operand.vmem [shape: f32[2,1,96], index: 8, kind: input, shape index: {}]   ;;  %s3760_s9 = inlined_call_operand.vmem [shape: f32[2,32,32], index: 9, kind: input, shape index: {}]   ;;  %s3761_s10 = inlined_call_operand.vmem [shape: f32[2,1,32], index: 10, kind: input, shape index: {}]   ;;  %s3762_s11 = inlined_call_operand.vmem [shape: f32[2,1,32], index: 11, kind: input, shape index: {}]   ;;  %s3763_s12 = inlined_call_operand.vmem [shape: f32[2,1,32], index: 12, kind: input, shape index: {}]   ;;  %s3764_s13 = inlined_call_operand.vmem [shape: f32[2,32,64], index: 13, kind: input, shape index: {}]   ;;  %s3765_s14 = inlined_call_operand.vmem [shape: f32[2,1,64], index: 14, kind: input, shape index: {}]   ;;  %s3766_s15 = inlined_call_operand.vmem [shape: f32[2,64,32], index: 15, kind: input, shape index: {}]   ;;  %s3767_s16 = inlined_call_operand.vmem [shape: f32[2,1,32], index: 16, kind: input, shape index: {}]   ;;  %s3768_s17 = inlined_call_operand.vmem [shape: f32[2,1,32], index: 17, kind: input, shape index: {}]   ;;  %s3769_s18 = inlined_call_operand.vmem [shape: f32[2,1,32], index: 18, kind: input, shape index: {}]   ;;  %s3770_s19 = inlined_call_operand.vmem [shape: f32[32,128], index: 19, kind: input, shape index: {}]   ;;  %s3771_s20 = inlined_call_operand.vmem [shape: f32[1,128], index: 20, kind: input, shape index: {}]   ;;  %s3772_s21 = inlined_call_operand.hbm [shape: f32[2,1,128], index: 21, kind: output, shape index: {}]  }
   0x1   :  { %3781 = sst [smem:[#allocation11_spill]] %s3751_s0 }
   0x2   :  { %3782 = sst [smem:[#allocation12_spill]] %s3752_s1 }
   0x3   :  { %3783 = sst [smem:[#allocation13_spill]] %s3753_s2 }
   0x4   :  { %3784 = sst [smem:[#allocation14_spill]] %s3754_s3 }
   0x5   :  { %3785 = sst [smem:[#allocation15_spill]] %s3755_s4 }
   0x6   :  { %3786 = sst [smem:[#allocation16_spill]] %s3756_s5 }
   0x7   :  { %3787 = sst [smem:[#allocation17_spill]] %s3771_s20 }
   0x8   :  { %3788 = sst [smem:[#allocation18_spill]] %s3772_s21 }
   0x9   :  { %26 = vsyncpa [#allocation3], 0 }
   0xa   :  { %28 = vsyncpa [#allocation3 + $0x1], 0  ;;  %s3237_s2 = smov 0   ;;  %s3239_s25 = smov 0  }
   0xb   :  { %s3241_s26 = smov 0   ;;  %s3243_s27 = smov 0  }
   0xc LB: > { %3789 = sst [smem:[#allocation5_spill]] %s3103_s2  ;;  %s3258_s3 = sadd.s32 4294967295, %s3115_s27   ;;  %s3115_s27 = sphi %s3243_s27, %s3808_s27   ;;  %s3111_s26 = sphi %s3241_s26, %s3810_s26   ;;  %s3107_s25 = sphi %s3239_s25, %s3812_s25   ;;  %s3103_s2 = sphi %s3237_s2, %s3811_s2  }
   0xd   : > { %3790 = sst [smem:[#allocation6_spill]] %s3111_s26  ;;  %s2612_s28 = sadd.s32 4294967294, %s3115_s27  }
   0xe   : > { %3791 = sst [smem:[#allocation7_spill]] %s3115_s27  ;;  %s3262_s29 = sadd.s32 1, %s3115_s27  }
   0xf   : > { %3792 = sst [smem:[#allocation8_spill]] %s3262_s29  ;;  %s492_s0 = sadd.s32 1, %s3111_s26 }
  0x10   : > { %s489_s4 = ssub.s32 %s3115_s27, %s3262_s29  ;;  %p502_p0 = scmp.ne.s32.totalorder %s3111_s26, %s3107_s25 }
  0x11   : > { %p490_p1 = scmp.eq.s32.totalorder %s489_s4, 0  ;;  %p503_p2 = scmp.eq.s32.totalorder %s3258_s3, 1 }
  0x12   : > { %p508_p3 = scmp.ne.s32.totalorder %s3107_s25, %s3103_s2  ;;  %p509_p4 = scmp.eq.s32.totalorder %s2612_s28, 1 }
  0x13   : > { %s3273_s30 = scalar_select %p490_p1, %s3111_s26, %s492_s0  }
  0x14   : > { %p3275_p5 = por %p503_p2, %p502_p0  ;;  %p3279_p6 = por %p509_p4, %p508_p3 }
  0x15   : > { %3793 = sst [smem:[#allocation9_spill]] %s3273_s30  ;;  %p2615_p7 = scmp.ge.s32.totalorder %s3115_s27, 1 }
  0x16   : > { %s3795_s22 = scalar_select %p3279_p6, 1, 0 }
  0x17   : > { %p597_p8 = scmp.lt.s32.totalorder %s3115_s27, 3 }
  0x18   : > { %3796 = sst [smem:[#allocation10_spill]] %s3795_s22 }
  0x19   : > { %p598_p9 = pnand %p2615_p7, %p597_p8 }
  0x1a   : > { %p658_p10 = scmp.lt.s32.totalorder (!%p598_p9), %s3258_s3, 1  ;;  %s3797_s24 = sld [smem:[#allocation13_spill]] (!%p598_p9) }
  0x1b   : > { %601 = sbr.rel (%p598_p9) target bundleno = 5901 (0x170d), region = 104  ;;  %s3798_s22 = sld [smem:[#allocation12_spill]] (!%p598_p9) }
  0x1c   : > { %s3799_s27 = sld [smem:[#allocation11_spill]] (!%p598_p9)  ;;  %s3124_s1 = smov (!%p598_p9), 112  }
  0x1d   : > { %s3800_s26 = sld [smem:[#allocation14_spill]] (!%p598_p9)  ;;  %s3125_s28 = smov (!%p598_p9), 48  }
  0x1e   : > { %s3802_s29 = sld [smem:[#allocation16_spill]] (!%p598_p9)  ;;  %s2689_s23 = sshll.u32 (!%p598_p9), %s3258_s3, 4 }
  0x1f   : > { %s3803_s0 = sld [smem:[#allocation17_spill]] (!%p598_p9) }
  0x20   : > { %v689_v0 = vld [vmem:[%s3797_s24 + $0x78] sm:$0xff]  ;;  %v666_v1 = vlaneseq  ;;  %v3117_v2 = vmov 0   ;;  %v3118_v3 = vmov 0.0   ;;  %v688_v4 = vld [vmem:[%s3797_s24 + $0x70] sm:$0xff]  ;;  %s659_s4 = scalar_select %p658_p10, %s3258_s3, 1  ;;  %v687_v6 = vld [vmem:[%s3797_s24 + $0x68] sm:$0xff] }
  0x21   : > { %3024 = vset.pattern.permute.xlu0 %v3117_v2  ;;  %2780 = vmatprep.subr.mxu0 %v3118_v3  ;;  %vm3119_vm0 = vmmov 0   ;;  %v686_v8 = vld [vmem:[%s3797_s24 + $0x60] sm:$0xff]  ;;  %v685_v12 = vld [vmem:[%s3797_s24 + $0x58] sm:$0xff]  ;;  %v684_v14 = vld [vmem:[%s3797_s24 + $0x50] sm:$0xff]  ;;  %v3120_v28 = vmov 1.0   ;;  %vm771_vm2 = vcmask 261120  }
  0x22   : > { %2781 = vmatpush3.msra.mxu0 %v689_v0  ;;  %v972_v5 = vshrl.u32 %v666_v1, 7  ;;  %2815 = vmatprep.subr.mxu1 %v3118_v3  ;;  %s2616_s30 = sshll.u32 %s659_s4, 3  ;;  %s664_s2 = scalar_lea.vmem %s3798_s22, %s659_s4  ;;  %v683_v16 = vld [vmem:[%s3797_s24 + $0x48] sm:$0xff]  ;;  %v682_v17 = vld [vmem:[%s3797_s24 + $0x40] sm:$0xff]  ;;  %v681_v18 = vld [vmem:[%s3797_s24 + $0x38] sm:$0xff]  ;;  %v667_v26 = vand.u32 127, %v666_v1 }
  0x23   : > { %2782 = vmatprep.subr.mxu0 %v3118_v3  ;;  %2812 = vmatprep.mubr.msk.f32.mxu0 %vm3119_vm0, %v3118_v3  ;;  %s661_s21 = scalar_lea.vmem %s3799_s27, %s2616_s30  ;;  %v800_v7 = vld [vmem:[%s664_s2] sm:$0x1]  ;;  %v680_v19 = vld [vmem:[%s3797_s24 + $0x30] sm:$0xff]  ;;  %v679_v20 = vld [vmem:[%s3797_s24 + $0x28] sm:$0xff]  ;;  %s3801_s2 = sld [smem:[#allocation15_spill]]  ;;  %vm894_vm3 = vcmask 130048  }
  0x24   : > { %2783 = vmatpush3.msra.mxu0 %v688_v4  ;;  %2823 = vmatprep.mubr.msk.f32.mxu1 %vm3119_vm0, %v3118_v3  ;;  %v665_v9 = vld [vmem:[%s661_s21] sm:$0xff]  ;;  %v801_v10 = vsub.f32 1.0, %v800_v7  ;;  %v973_v11 = vsub.s32 0, %v972_v5  ;;  %v677_v22 = vld [vmem:[%s3797_s24 + $0x18] sm:$0xff]  ;;  %v676_v23 = vld [vmem:[%s3797_s24 + $0x10] sm:$0xff]  ;;  %s3121_s30 = smov 96  }
  0x25   : > { %2784 = vmatprep.subr.mxu0 %v3118_v3  ;;  %669 = vperm.xlu0 %3024, %v665_v9   ;;  %v678_v21 = vld [vmem:[%s3797_s24 + $0x20] sm:$0xff]  ;;  %v675_v24 = vld [vmem:[%s3797_s24 + $0x8] sm:$0xff]  ;;  %v806_v41 = vld [vmem:[%s3758_s7 + $0x18] sm:$0xff]  ;;  %vm977_vm4 = vcmask 64512   ;;  %s3122_s22 = smov 80   ;;  %s3123_s4 = smov 64  }
  0x26   : > { %2785 = vmatpush3.msra.mxu0 %v687_v6  ;;  %v802_v13 = vmul.f32 -1e+09, %v801_v10  ;;  %v674_v25 = vld [vmem:[%s3797_s24] sm:$0xff]  ;;  %v805_v42 = vld [vmem:[%s3758_s7 + $0x10] sm:$0xff]  ;;  %2816 = vmatpush3.msra.mxu1 %v806_v41  ;;  %v804_v43 = vld [vmem:[%s3758_s7 + $0x8] sm:$0xff]  ;;  %vm1524_vm5 = vcmask 523264  }
  0x27   : > { %2786 = vmatprep.subr.mxu0 %v3118_v3  ;;  %v690_v29 = vld [vmem:[%s3800_s26] sm:$0xff]  ;;  %2817 = vmatprep.subr.mxu1 %v3118_v3  ;;  %s3804_s21 = sld [smem:[#allocation18_spill]] }
  0x28   : > { %2787 = vmatpush3.msra.mxu0 %v686_v8  ;;  %v3322_v15 = vrot.slane %v802_v13, %v973_v11  ;;  %2818 = vmatpush3.msra.mxu1 %v805_v42  ;;  %v803_v44 = vld [vmem:[%s3758_s7] sm:$0xff] }
  0x29   : > { %2788 = vmatprep.subr.mxu0 %v3118_v3  ;;  %v2619_v31 = vld [vmem:[%s3801_s2] ss:$0 sm:$0xff]  ;;  %2819 = vmatprep.subr.mxu1 %v3118_v3 }
  0x2a   : > { %2789 = vmatpush3.msra.mxu0 %v685_v12  ;;  %2820 = vmatpush3.msra.mxu1 %v804_v43  ;;  %v2620_v49 = vld [vmem:[%s3802_s29] ss:$0 sm:$0xff] }
  0x2b   : > { %2790 = vmatprep.subr.mxu0 %v3118_v3  ;;  %2821 = vmatprep.subr.mxu1 %v3118_v3  ;;  %v2621_v51 = vld [vmem:[%s3757_s6] ss:$0 sm:$0xff] }
  0x2c   : > { %2791 = vmatpush3.msra.mxu0 %v684_v14  ;;  %2822 = vmatpush3.msra.mxu1 %v803_v44  ;;  %v2622_v54 = vld [vmem:[%s3759_s8] ss:$0 sm:$0xff] }
  0x2d   : > { %2792 = vmatprep.subr.mxu0 %v3118_v3  ;;  %2826 = vmatprep.subr.mxu1 %v3118_v3  ;;  %s3716_s27 = scalar_lea.hbm %s3804_s21, %s2689_s23 }
  0x2e   : > { %2793 = vmatpush3.msra.mxu0 %v683_v16 }
  0x2f   : > { %2794 = vmatprep.subr.mxu0 %v3118_v3 }
  0x30   : > { %2795 = vmatpush3.msra.mxu0 %v682_v17 }
  0x31   : > { %2796 = vmatprep.subr.mxu0 %v3118_v3 }
  0x32   : > { %2797 = vmatpush3.msra.mxu0 %v681_v18 }
  0x33   : > { %2798 = vmatprep.subr.mxu0 %v3118_v3 }
  0x34   : > { %2799 = vmatpush3.msra.mxu0 %v680_v19 }
  0x35   : > { %2800 = vmatprep.subr.mxu0 %v3118_v3 }
  0x36   : > { %2801 = vmatpush3.msra.mxu0 %v679_v20 }
  0x37   : > { %2802 = vmatprep.subr.mxu0 %v3118_v3 }
  0x38   : > { %2803 = vmatpush3.msra.mxu0 %v678_v21 }
  0x39   : > { %2804 = vmatprep.subr.mxu0 %v3118_v3 }
  0x3a   : > { %2805 = vmatpush3.msra.mxu0 %v677_v22 }
  0x3b   : > { %2806 = vmatprep.subr.mxu0 %v3118_v3 }
  0x3c   : > { %2807 = vmatpush3.msra.mxu0 %v676_v23 }
  0x3d   : > { %2808 = vmatprep.subr.mxu0 %v3118_v3 }
  0x3e   : > { %2809 = vmatpush3.msra.mxu0 %v675_v24 }
  0x3f   : > { %2810 = vmatprep.subr.mxu0 %v3118_v3 }
  0x40   : > { %2811 = vmatpush3.msra.mxu0 %v674_v25 }
  0x41   : > { %2860 = vmatprep.subr.mxu0 %v3118_v3 }
  0xa0   : > { %v670_v27 = vpop.permute.xlu0 %669 }
  0xa1   : > { %vm671_vm1 = vcmp.eq.s32.totalorder %v667_v26, %v670_v27 }
  0xa2   : > { %2813 = vmatmul.mubr.msk.f32.vlgmr.msra.gmra.mxu0 %vm671_vm1, %v3120_v28 }
  0xa3   : > { %2868 = vmatprep.mubr.msk.f32.mxu0 %vm3119_vm0, %v3118_v3 }
 0x162   : > { %v757_v30 = vpop.f32.mrf.mxu0 }
 0x163   : > { %v758_v32 = vadd.f32 %v757_v30, %v690_v29  ;;  %v890_v29 = vld [vmem:[%s3760_s9 + $0x18] sm:$0xff]  ;;  %v889_v30 = vld [vmem:[%s3760_s9 + $0x10] sm:$0xff] }
 0x164   : > { %v2814_v33 = vpop.f32.mrf.mxu0 }
 0x165   : > { %v768_v34 = vadd.f32 %v2619_v31, %v758_v32  ;;  %v888_v31 = vld [vmem:[%s3760_s9 + $0x8] sm:$0xff]  ;;  %v887_v33 = vld [vmem:[%s3760_s9] sm:$0xff] }
 0x167   : > { %v772_v35 = vsel %vm771_vm2, %v768_v34, 0.0 }
 0x168   : > { %773 = vadd.xlane.f32.xlu0 %v772_v35 }
 0x1f1   : > { %v774_v36 = vpop.xlane.xlu0 %773 }
 0x1f2   : > { %v776_v37 = vmul.f32 0.03125, %v774_v36 }
 0x1f4   : > { %v777_v38 = vsub.f32 %v768_v34, %v776_v37 }
 0x1f6   : > { %v778_v39 = vmul.f32 %v777_v38, %v777_v38 }
 0x1f8   : > { %v779_v40 = vsel %vm771_vm2, %v778_v39, 0.0 }
 0x1f9   : > { %780 = vadd.xlane.f32.xlu1 %v779_v40 }
 0x282   : > { %v781_v45 = vpop.xlane.xlu1 %780 }
 0x283   : > { %v782_v46 = vmul.f32 0.03125, %v781_v45 }
 0x285   : > { %v783_v47 = vadd.f32 1e-12, %v782_v46 }
 0x287   : > { %3025 = vrsqrt.f32 %v783_v47 }
 0x294   : > { %v3026_v48 = vpop.eup %3025 }
 0x295   : > { %v785_v50 = vmul.f32 %v3026_v48, %v777_v38  ;;  %v2632_v38 = vld [vmem:[%s3761_s10] ss:$0 sm:$0xff] }
 0x297   : > { %v792_v52 = vmul.f32 %v2620_v49, %v785_v50  ;;  %v1419_v49 = vld [vmem:[%s3764_s13 + $0x18] sm:$0xff]  ;;  %v1418_v50 = vld [vmem:[%s3764_s13 + $0x10] sm:$0xff] }
 0x298   : > { %2861 = vmatpush3.msra.mxu0 %v1419_v49 }
 0x299   : > { %v3399_v53 = vadd.f32 %v2621_v51, %v792_v52  ;;  %2862 = vmatprep.subr.mxu0 %v3118_v3  ;;  %v1417_v51 = vld [vmem:[%s3764_s13 + $0x8] sm:$0xff]  ;;  %v1416_v52 = vld [vmem:[%s3764_s13] sm:$0xff] }
 0x29a   : > { %2863 = vmatpush3.msra.mxu0 %v1418_v50 }
 0x29b   : > { %2824 = vmatmul.mubr.msk.f32.vlgmr.msra.gmra.mxu1 %vm771_vm2, %v3399_v53  ;;  %2864 = vmatprep.subr.mxu0 %v3118_v3 }
 0x29c   : > { %2828 = vmatprep.mubr.msk.f32.mxu1 %vm3119_vm0, %v3118_v3  ;;  %2865 = vmatpush3.msra.mxu0 %v1417_v51 }
 0x29d   : > { %2866 = vmatprep.subr.mxu0 %v3118_v3 }
 0x29e   : > { %2867 = vmatpush3.msra.mxu0 %v1416_v52 }
 0x29f   : > { %2890 = vmatprep.subr.mxu0 %v3118_v3 }
 0x35b   : > { %v883_v55 = vpop.f32.mrf.mxu1 }
 0x35c   : > { %v884_v56 = vadd.f32 %v2622_v54, %v883_v55 }
 0x35d   : > { %v2825_v57 = vpop.f32.mrf.mxu1 }
 0x35e   : > { %892 = vrot.lane.b32.xlu1 %v884_v56, %s3121_s30  ;;  %v2633_v57 = vld [vmem:[%s3762_s11] ss:$0 sm:$0xff] }
 0x3d0   : > { %v893_v58 = vpop.permute.xlu1 %892 }
 0x3d1   : > { %2827 = vmatpush3.xpose.msk.msra.mxu1 %vm894_vm3, %v893_v58 }
 0x3d2   : > { %2831 = vmatprep.subr.mxu1 %v3118_v3 }
 0x3d4   : > { %2829 = vmatmul.mubr.msk.f32.vlgmr.msra.gmra.mxu1 %vm894_vm3, %v884_v56 }
 0x3d5   : > { %2833 = vmatprep.mubr.msk.f32.mxu1 %vm3119_vm0, %v3118_v3 }
 0x494   : > { %v965_v59 = vpop.f32.mrf.mxu1 }
 0x495   : > { %v969_v60 = vmul.f32 0.25, %v965_v59  ;;  %v2634_v59 = vld [vmem:[%s3763_s12] ss:$0 sm:$0xff] }
 0x496   : > { %v2830_v61 = vpop.f32.mrf.mxu1 }
 0x497   : > { %v976_v62 = vadd.f32 %v3322_v15, %v969_v60 }
 0x499   : > { %v978_v63 = vsel %vm977_vm4, %v976_v62, -inf }
 0x49a   : > { %979 = vmax.xlane.f32.xlu1 %v978_v63  ;;  %v1515_v63 = vld [vmem:[%s3766_s15 + $0x30] sm:$0xff] }
 0x4ab   : > { %1067 = vrot.lane.b32.xlu1 %v884_v56, %s3122_s22 }
 0x523   : > { %v980_v0 = vpop.xlane.xlu1 %979 }
 0x524   : > { %v981_v1 = vsub.f32 %v976_v62, %v980_v0  ;;  %v1516_v62 = vld [vmem:[%s3766_s15 + $0x38] sm:$0xff]  ;;  %v1514_v0 = vld [vmem:[%s3766_s15 + $0x28] sm:$0xff] }
 0x526   : > { %v982_v2 = vmul.f32 1.442695, %v981_v1  ;;  %v1513_v1 = vld [vmem:[%s3766_s15 + $0x20] sm:$0xff] }
 0x527   : > { %v1068_v10 = vpop.permute.xlu1 %1067 }
 0x528   : > { %3027 = vpow2.f32 %v982_v2  ;;  %v1512_v2 = vld [vmem:[%s3766_s15 + $0x18] sm:$0xff] }
 0x535   : > { %v3028_v4 = vpop.eup %3027 }
 0x536   : > { %v984_v5 = vsel %vm977_vm4, %v3028_v4, 0.0 }
 0x537   : > { %985 = vadd.xlane.f32.xlu0 %v984_v5  ;;  %v1510_v5 = vld [vmem:[%s3766_s15 + $0x8] sm:$0xff] }
 0x54d   : > { %989 = vrot.lane.b32.xlu0 %v884_v56, %s3123_s4 }
 0x551   : > { %1065 = vrot.lane.b32.xlu0 %v884_v56, %s3124_s1 }
 0x5c0   : > { %v986_v6 = vpop.xlane.xlu0 %985 }
 0x5c1   : > { %3029 = vrcp.f32 %v986_v6  ;;  %v1509_v6 = vld [vmem:[%s3766_s15] sm:$0xff] }
 0x5c4   : > { %v990_v7 = vpop.permute.xlu0 %989 }
 0x5c5   : > { %2832 = vmatpush3.msra.mxu1 %v990_v7  ;;  %v2635_v7 = vld [vmem:[%s3765_s14] ss:$0 sm:$0xff] }
 0x5c6   : > { %2836 = vmatprep.subr.mxu1 %v3118_v3 }
 0x5c8   : > { %v1066_v11 = vpop.permute.xlu0 %1065 }
 0x5ce   : > { %v3030_v8 = vpop.eup %3029 }
 0x5cf   : > { %v988_v9 = vmul.f32 %v3030_v8, %v3028_v4  ;;  %v1511_v4 = vld [vmem:[%s3766_s15 + $0x10] sm:$0xff] }
 0x5d1   : > { %2834 = vmatmul.mubr.msk.f32.vlgmr.msra.gmra.mxu1 %vm977_vm4, %v988_v9 }
 0x5d2   : > { %2837 = vmatpush3.xpose.msk.msra.mxu1 %vm894_vm3, %v1068_v10  ;;  %2838 = vmatprep.mubr.msk.f32.mxu1 %vm3119_vm0, %v3118_v3 }
 0x5d3   : > { %2841 = vmatprep.subr.mxu1 %v3118_v3 }
 0x5d5   : > { %2839 = vmatmul.mubr.msk.f32.vlgmr.msra.gmra.mxu1 %vm894_vm3, %v1066_v11 }
 0x5d6   : > { %2843 = vmatprep.mubr.msk.f32.mxu1 %vm3119_vm0, %v3118_v3 }
 0x691   : > { %v1061_v12 = vpop.f32.mrf.mxu1 }
 0x693   : > { %v2835_v13 = vpop.f32.mrf.mxu1 }
 0x695   : > { %v1139_v14 = vpop.f32.mrf.mxu1 }
 0x696   : > { %v1143_v16 = vmul.f32 0.25, %v1139_v14 }
 0x697   : > { %v2840_v17 = vpop.f32.mrf.mxu1 }
 0x698   : > { %v1144_v18 = vadd.f32 %v1143_v16, %v3322_v15 }
 0x69a   : > { %v1145_v19 = vsel %vm977_vm4, %v1144_v18, -inf }
 0x69b   : > { %1146 = vmax.xlane.f32.xlu0 %v1145_v19 }
 0x6b1   : > { %1156 = vrot.lane.b32.xlu0 %v884_v56, %s3125_s28 }
 0x724   : > { %v1147_v20 = vpop.xlane.xlu0 %1146 }
 0x725   : > { %v1148_v21 = vsub.f32 %v1144_v18, %v1147_v20 }
 0x727   : > { %v1149_v22 = vmul.f32 1.442695, %v1148_v21  ;;  %v2637_v21 = vld [vmem:[%s3767_s16] ss:$0 sm:$0xff] }
 0x728   : > { %v1157_v23 = vpop.permute.xlu0 %1156 }
 0x729   : > { %3031 = vpow2.f32 %v1149_v22  ;;  %2842 = vmatpush3.msra.mxu1 %v1157_v23 }
 0x72a   : > { %2846 = vmatprep.subr.mxu1 %v3118_v3 }
 0x736   : > { %v3032_v24 = vpop.eup %3031 }
 0x737   : > { %v1151_v25 = vsel %vm977_vm4, %v3032_v24, 0.0 }
 0x738   : > { %1152 = vadd.xlane.f32.xlu1 %v1151_v25 }
 0x7c1   : > { %v1153_v26 = vpop.xlane.xlu1 %1152 }
 0x7c2   : > { %3033 = vrcp.f32 %v1153_v26 }
 0x7cf   : > { %v3034_v27 = vpop.eup %3033 }
 0x7d0   : > { %v1155_v28 = vmul.f32 %v3034_v27, %v3032_v24 }
 0x7d2   : > { %2844 = vmatmul.mubr.msk.f32.vlgmr.msra.gmra.mxu1 %vm977_vm4, %v1155_v28 }
 0x7d3   : > { %2847 = vmatpush3.msra.mxu1 %v890_v29  ;;  %2850 = vmatprep.mubr.msk.f32.mxu1 %vm3119_vm0, %v3118_v3 }
 0x7d4   : > { %2848 = vmatprep.subr.mxu1 %v3118_v3 }
 0x7d5   : > { %2849 = vmatpush3.msra.mxu1 %v889_v30 }
 0x7d6   : > { %2853 = vmatprep.subr.mxu1 %v3118_v3 }
 0x892   : > { %v1228_v32 = vpop.f32.mrf.mxu1 }
 0x893   : > { %2851 = vmatmul.mubr.msk.f32.vlgmr.msra.gmra.mxu1 %vm894_vm3, %v1228_v32  ;;  %v2644_v32 = vld [vmem:[%s3758_s7 + $0x38] sm:$0xff] }
 0x894   : > { %v2845_v34 = vpop.f32.mrf.mxu1  ;;  %2854 = vmatpush3.msra.mxu1 %v888_v31  ;;  %2857 = vmatprep.mubr.msk.f32.mxu1 %vm3119_vm0, %v3118_v3 }
 0x895   : > { %2855 = vmatprep.subr.mxu1 %v3118_v3  ;;  %v2642_v34 = vld [vmem:[%s3758_s7 + $0x28] sm:$0xff] }
 0x896   : > { %2856 = vmatpush3.msra.mxu1 %v887_v33  ;;  %v2643_v33 = vld [vmem:[%s3758_s7 + $0x30] sm:$0xff] }
 0x897   : > { %2858 = vmatmul.mubr.msk.f32.vlgmr.msra.gmra.mxu1 %vm894_vm3, %v1061_v12  ;;  %2871 = vmatprep.subr.mxu1 %v3118_v3 }
 0x898   : > { %2887 = vmatprep.mubr.msk.f32.mxu1 %vm3119_vm0, %v3118_v3  ;;  %2872 = vmatpush3.msra.mxu1 %v1516_v62 }
 0x899   : > { %2873 = vmatprep.subr.mxu1 %v3118_v3 }
 0x89a   : > { %2874 = vmatpush3.msra.mxu1 %v1515_v63 }
 0x89b   : > { %2875 = vmatprep.subr.mxu1 %v3118_v3 }
 0x89c   : > { %2876 = vmatpush3.msra.mxu1 %v1514_v0 }
 0x89d   : > { %2877 = vmatprep.subr.mxu1 %v3118_v3 }
 0x89e   : > { %2878 = vmatpush3.msra.mxu1 %v1513_v1 }
 0x89f   : > { %2879 = vmatprep.subr.mxu1 %v3118_v3 }
 0x8a0   : > { %2880 = vmatpush3.msra.mxu1 %v1512_v2 }
 0x8a1   : > { %2881 = vmatprep.subr.mxu1 %v3118_v3 }
 0x8a2   : > { %2882 = vmatpush3.msra.mxu1 %v1511_v4 }
 0x8a3   : > { %2883 = vmatprep.subr.mxu1 %v3118_v3 }
 0x8a4   : > { %2884 = vmatpush3.msra.mxu1 %v1510_v5 }
 0x8a5   : > { %2885 = vmatprep.subr.mxu1 %v3118_v3 }
 0x8a6   : > { %2886 = vmatpush3.msra.mxu1 %v1509_v6 }
 0x8a7   : > { %2906 = vmatprep.subr.mxu1 %v3118_v3 }
 0x953   : > { %v1301_v35 = vpop.f32.mrf.mxu1 }
 0x955   : > { %v2852_v36 = vpop.f32.mrf.mxu1 }
 0x957   : > { %v1374_v37 = vpop.f32.mrf.mxu1 }
 0x958   : > { %v1375_v39 = vadd.f32 %v1374_v37, %v1301_v35  ;;  %v2641_v35 = vld [vmem:[%s3758_s7 + $0x20] sm:$0xff] }
 0x959   : > { %v2859_v40 = vpop.f32.mrf.mxu1 }
 0x95a   : > { %v1385_v41 = vadd.f32 %v2632_v38, %v1375_v39  ;;  %v2639_v40 = vld [vmem:[%s3768_s17] ss:$0 sm:$0xff] }
 0x95c   : > { %v1386_v42 = vadd.f32 %v1385_v41, %v3399_v53 }
 0x95e   : > { %v1389_v43 = vsel %vm771_vm2, %v1386_v42, 0.0 }
 0x95f   : > { %1390 = vadd.xlane.f32.xlu1 %v1389_v43 }
 0x9e8   : > { %v1391_v44 = vpop.xlane.xlu1 %1390 }
 0x9e9   : > { %v1392_v45 = vmul.f32 0.03125, %v1391_v44 }
 0x9eb   : > { %v1393_v46 = vsub.f32 %v1386_v42, %v1392_v45  ;;  %v2640_v42 = vld [vmem:[%s3769_s18] ss:$0 sm:$0xff]  ;;  %v2646_v45 = vld [vmem:[%s3759_s8 + $0x1] ss:$0 sm:$0xff] }
 0x9ed   : > { %v1394_v47 = vmul.f32 %v1393_v46, %v1393_v46 }
 0x9ef   : > { %v1395_v48 = vsel %vm771_vm2, %v1394_v47, 0.0 }
 0x9f0   : > { %1396 = vadd.xlane.f32.xlu1 %v1395_v48 }
 0xa79   : > { %v1397_v53 = vpop.xlane.xlu1 %1396 }
 0xa7a   : > { %v1398_v54 = vmul.f32 0.03125, %v1397_v53 }
 0xa7c   : > { %v1399_v55 = vadd.f32 1e-12, %v1398_v54 }
 0xa7e   : > { %3035 = vrsqrt.f32 %v1399_v55 }
 0xa8b   : > { %v3036_v56 = vpop.eup %3035 }
 0xa8c   : > { %v1401_v58 = vmul.f32 %v3036_v56, %v1393_v46 }
 0xa8e   : > { %v1408_v60 = vmul.f32 %v2633_v57, %v1401_v58 }
 0xa90   : > { %v1415_v61 = vadd.f32 %v2634_v59, %v1408_v60 }
 0xa92   : > { %2869 = vmatmul.mubr.msk.f32.vlgmr.msra.gmra.mxu0 %vm771_vm2, %v1415_v61 }
 0xa93   : > { %2898 = vmatprep.mubr.msk.f32.mxu0 %vm3119_vm0, %v3118_v3  ;;  %2891 = vmatpush3.msra.mxu0 %v2644_v32 }
 0xa94   : > { %2892 = vmatprep.subr.mxu0 %v3118_v3 }
 0xa95   : > { %2893 = vmatpush3.msra.mxu0 %v2643_v33 }
 0xa96   : > { %2894 = vmatprep.subr.mxu0 %v3118_v3 }
 0xa97   : > { %2895 = vmatpush3.msra.mxu0 %v2642_v34 }
 0xa98   : > { %2896 = vmatprep.subr.mxu0 %v3118_v3 }
 0xa99   : > { %2897 = vmatpush3.msra.mxu0 %v2641_v35 }
 0xa9a   : > { %2901 = vmatprep.subr.mxu0 %v3118_v3 }
 0xb52   : > { %v1496_v8 = vpop.f32.mrf.mxu0 }
 0xb53   : > { %v1497_v9 = vadd.f32 %v2635_v7, %v1496_v8 }
 0xb54   : > { %v2870_v10 = vpop.f32.mrf.mxu0 }
 0xb55   : > { %v1500_v11 = vmul.f32 %v1497_v9, %v1497_v9 }
 0xb57   : > { %v1501_v12 = vmul.f32 %v1500_v11, %v1497_v9 }
 0xb59   : > { %v1502_v13 = vmul.f32 0.044715, %v1501_v12 }
 0xb5b   : > { %v1503_v14 = vadd.f32 %v1502_v13, %v1497_v9 }
 0xb5d   : > { %v1504_v16 = vmul.f32 0.7978846, %v1503_v14 }
 0xb5f   : > { %3037 = vtanh.f32 %v1504_v16 }
 0xb6c   : > { %v3038_v17 = vpop.eup %3037 }
 0xb6d   : > { %v1506_v18 = vadd.f32 1.0, %v3038_v17  ;;  %v2649_v17 = vld [vmem:[%s3760_s9 + $0x28] sm:$0xff] }
 0xb6f   : > { %v1507_v19 = vmul.f32 0.5, %v1506_v18  ;;  %v2648_v18 = vld [vmem:[%s3760_s9 + $0x20] sm:$0xff] }
 0xb71   : > { %v1508_v20 = vmul.f32 %v1507_v19, %v1497_v9  ;;  %v2651_v19 = vld [vmem:[%s3760_s9 + $0x38] sm:$0xff] }
 0xb73   : > { %2888 = vmatmul.mubr.msk.f32.vlgmr.msra.gmra.mxu1 %vm1524_vm5, %v1508_v20  ;;  %v2650_v20 = vld [vmem:[%s3760_s9 + $0x30] sm:$0xff] }
 0xb74   : > { %2908 = vmatprep.mubr.msk.f32.mxu1 %vm3119_vm0, %v3118_v3 }
 0xc33   : > { %v1594_v22 = vpop.f32.mrf.mxu1 }
 0xc34   : > { %v1595_v23 = vadd.f32 %v2637_v21, %v1594_v22 }
 0xc35   : > { %v2889_v24 = vpop.f32.mrf.mxu1 }
 0xc36   : > { %v1598_v25 = vadd.f32 %v1595_v23, %v1415_v61 }
 0xc38   : > { %v1601_v26 = vsel %vm771_vm2, %v1598_v25, 0.0 }
 0xc39   : > { %1602 = vadd.xlane.f32.xlu0 %v1601_v26 }
 0xcc2   : > { %v1603_v27 = vpop.xlane.xlu0 %1602 }
 0xcc3   : > { %v1604_v28 = vmul.f32 0.03125, %v1603_v27 }
 0xcc5   : > { %v1605_v29 = vsub.f32 %v1598_v25, %v1604_v28  ;;  %v2661_v28 = vld [vmem:[%s3761_s10 + $0x1] ss:$0 sm:$0xff] }
 0xcc7   : > { %v1606_v30 = vmul.f32 %v1605_v29, %v1605_v29 }
 0xcc9   : > { %v1607_v31 = vsel %vm771_vm2, %v1606_v30, 0.0 }
 0xcca   : > { %1608 = vadd.xlane.f32.xlu1 %v1607_v31 }
 0xd53   : > { %v1609_v36 = vpop.xlane.xlu1 %1608 }
 0xd54   : > { %v1610_v37 = vmul.f32 0.03125, %v1609_v36 }
 0xd56   : > { %v1611_v38 = vadd.f32 1e-12, %v1610_v37 }
 0xd58   : > { %3039 = vrsqrt.f32 %v1611_v38 }
 0xd65   : > { %v3040_v39 = vpop.eup %3039 }
 0xd66   : > { %v1613_v41 = vmul.f32 %v3040_v39, %v1605_v29  ;;  %v2669_v39 = vld [vmem:[%s3764_s13 + $0x38] sm:$0xff] }
 0xd68   : > { %v1620_v43 = vmul.f32 %v2639_v40, %v1613_v41  ;;  %v2668_v40 = vld [vmem:[%s3764_s13 + $0x30] sm:$0xff]  ;;  %v2667_v41 = vld [vmem:[%s3764_s13 + $0x28] sm:$0xff] }
 0xd6a   : > { %v3555_v44 = vadd.f32 %v2640_v42, %v1620_v43  ;;  %v2666_v42 = vld [vmem:[%s3764_s13 + $0x20] sm:$0xff] }
 0xd6c   : > { %2899 = vmatmul.mubr.msk.f32.vlgmr.msra.gmra.mxu0 %vm771_vm2, %v3555_v44 }
 0xd6d   : > { %2903 = vmatprep.mubr.msk.f32.mxu0 %vm3119_vm0, %v3118_v3 }
 0xe2c   : > { %v1710_v46 = vpop.f32.mrf.mxu0 }
 0xe2d   : > { %v1711_v47 = vadd.f32 %v2646_v45, %v1710_v46 }
 0xe2e   : > { %v2900_v48 = vpop.f32.mrf.mxu0 }
 0xe2f   : > { %1720 = vrot.lane.b32.xlu1 %v1711_v47, %s3121_s30 }
 0xe33   : > { %1887 = vrot.lane.b32.xlu1 %v1711_v47, %s3122_s22 }
 0xe37   : > { %1885 = vrot.lane.b32.xlu1 %v1711_v47, %s3124_s1  ;;  %s3126_s1 = smov [#allocation2]  }
 0xe38   : > { %s3059_s3 = sshll.u32 %s3126_s1, 4  ;;  %s3060_s3 = int_to_ptr.vmem [resolvable:$false] %s3059_s3 }
 0xea1   : > { %v1721_v49 = vpop.permute.xlu1 %1720 }
 0xea2   : > { %2902 = vmatpush3.xpose.msk.msra.mxu0 %vm894_vm3, %v1721_v49  ;;  %v2665_v49 = vld [vmem:[%s3763_s12 + $0x1] ss:$0 sm:$0xff] }
 0xea3   : > { %2911 = vmatprep.subr.mxu0 %v3118_v3 }
 0xea5   : > { %2904 = vmatmul.mubr.msk.f32.vlgmr.msra.gmra.mxu0 %vm894_vm3, %v1711_v47  ;;  %v1888_v50 = vpop.permute.xlu1 %1887 }
 0xea6   : > { %2912 = vmatpush3.xpose.msk.msra.mxu0 %vm894_vm3, %v1888_v50  ;;  %2913 = vmatprep.mubr.msk.f32.mxu0 %vm3119_vm0, %v3118_v3 }
 0xea7   : > { %2921 = vmatprep.subr.mxu0 %v3118_v3 }
 0xea9   : > { %v1886_v51 = vpop.permute.xlu1 %1885 }
 0xeaa   : > { %2914 = vmatmul.mubr.msk.f32.vlgmr.msra.gmra.mxu0 %vm894_vm3, %v1886_v51 }
 0xeab   : > { %2925 = vmatprep.mubr.msk.f32.mxu0 %vm3119_vm0, %v3118_v3  ;;  %2922 = vmatpush3.msra.mxu0 %v2651_v19 }
 0xeac   : > { %2923 = vmatprep.subr.mxu0 %v3118_v3 }
 0xead   : > { %2924 = vmatpush3.msra.mxu0 %v2650_v20 }
 0xeae   : > { %2935 = vmatprep.subr.mxu0 %v3118_v3 }
 0xf65   : > { %v1792_v52 = vpop.f32.mrf.mxu0 }
 0xf66   : > { %v1796_v53 = vmul.f32 0.25, %v1792_v52  ;;  %v2680_v52 = vld [vmem:[%s3766_s15 + $0x78] sm:$0xff] }
 0xf67   : > { %v2905_v54 = vpop.f32.mrf.mxu0 }
 0xf68   : > { %v1797_v55 = vadd.f32 %v1796_v53, %v3322_v15  ;;  %v2679_v53 = vld [vmem:[%s3766_s15 + $0x70] sm:$0xff]  ;;  %v2678_v54 = vld [vmem:[%s3766_s15 + $0x68] sm:$0xff] }
 0xf6a   : > { %v1959_v56 = vpop.f32.mrf.mxu0  ;;  %v1798_v57 = vsel %vm977_vm4, %v1797_v55, -inf }
 0xf6b   : > { %v1963_v58 = vmul.f32 0.25, %v1959_v56  ;;  %1799 = vmax.xlane.f32.xlu1 %v1798_v57  ;;  %v2676_v56 = vld [vmem:[%s3766_s15 + $0x58] sm:$0xff]  ;;  %v2675_v57 = vld [vmem:[%s3766_s15 + $0x50] sm:$0xff] }
 0xf6c   : > { %v2915_v59 = vpop.f32.mrf.mxu0 }
 0xf6d   : > { %v1964_v60 = vadd.f32 %v1963_v58, %v3322_v15  ;;  %v2674_v58 = vld [vmem:[%s3766_s15 + $0x48] sm:$0xff]  ;;  %v2673_v59 = vld [vmem:[%s3766_s15 + $0x40] sm:$0xff] }
 0xf6f   : > { %v1965_v61 = vsel %vm977_vm4, %v1964_v60, -inf }
 0xf70   : > { %1966 = vmax.xlane.f32.xlu0 %v1965_v61 }
 0xf86   : > { %1809 = vrot.lane.b32.xlu0 %v1711_v47, %s3123_s4  ;;  %s656_s4 = sand.u32 1, %s3107_s25  }
 0xf87   : > { %s657_s26 = scalar_lea.vmem [#allocation2], %s656_s4  ;;  %s2536_s30 = scalar_lea.sflag [#allocation3], %s656_s4 }
 0xf88   : > { %s2548_s29 = sshll.u32 %s657_s26, 4  ;;  %s2549_s29 = int_to_ptr.vmem [resolvable:$true] %s2548_s29 }
 0xf89   : > { %s3055_s22 = scalar_lea.vmem %s2549_s29, 16  ;;  %p3062_p0 = scmp.lt.s32.totalorder %s2549_s29, %s3060_s3 }
 0xf8a   : > { %p3056_p11 = scmp.ne.s32.totalorder %s2549_s29, %s3055_s22 }
 0xf8c   : > { %p3057_p12 = pnand %p3056_p11, %p3275_p5 }
 0xf8e   : > { %p3058_p13 = pneg %p3057_p12 }
 0xff4   : > { %v1800_v62 = vpop.xlane.xlu1 %1799 }
 0xff5   : > { %v1801_v63 = vsub.f32 %v1797_v55, %v1800_v62  ;;  %v2677_v55 = vld [vmem:[%s3766_s15 + $0x60] sm:$0xff] }
 0xff7   : > { %v1802_v0 = vmul.f32 1.442695, %v1801_v63 }
 0xff9   : > { %3041 = vpow2.f32 %v1802_v0  ;;  %v1967_v1 = vpop.xlane.xlu0 %1966 }
 0xffa   : > { %v1968_v2 = vsub.f32 %v1964_v60, %v1967_v1  ;;  %v2671_v60 = vld [vmem:[%s3765_s14 + $0x1] ss:$0 sm:$0xff] }
 0xffc   : > { %v1969_v4 = vmul.f32 1.442695, %v1968_v2 }
 0xffd   : > { %v1810_v5 = vpop.permute.xlu0 %1809 }
 0xffe   : > { %3043 = vpow2.f32 %v1969_v4  ;;  %2907 = vmatpush3.msra.mxu1 %v1810_v5 }
 0xfff   : > { %2916 = vmatprep.subr.mxu1 %v3118_v3 }
0x1006   : > { %v3042_v6 = vpop.eup %3041 }
0x1007   : > { %v1804_v15 = vsel %vm977_vm4, %v3042_v6, 0.0 }
0x1008   : > { %1805 = vadd.xlane.f32.xlu0 %v1804_v15 }
0x100b   : > { %v3044_v7 = vpop.eup %3043 }
0x100c   : > { %v1971_v8 = vsel %vm977_vm4, %v3044_v7, 0.0 }
0x100d   : > { %1972 = vadd.xlane.f32.xlu0 %v1971_v8 }
0x1023   : > { %1976 = vrot.lane.b32.xlu0 %v1711_v47, %s3125_s28  ;;  %v2664_v47 = vld [vmem:[%s3762_s11 + $0x1] ss:$0 sm:$0xff]  ;;  %s3061_s28 = scalar_lea.vmem %s3060_s3, 32 }
0x1024   : > { %p3063_p1 = scmp.lt.s32.totalorder %s3061_s28, %s3055_s22 }
0x1026   : > { %p3064_p2 = por %p3063_p1, %p3062_p0 }
0x1028   : > { %p3065_p3 = pnand %p3064_p2, %p3058_p13 }
0x1091   : > { %v1806_v9 = vpop.xlane.xlu0 %1805 }
0x1092   : > { %3045 = vrcp.f32 %v1806_v9  ;;  %v2682_v9 = vld [vmem:[%s3767_s16 + $0x1] ss:$0 sm:$0xff] }
0x1096   : > { %v1973_v10 = vpop.xlane.xlu0 %1972 }
0x1097   : > { %3047 = vrcp.f32 %v1973_v10 }
0x109a   : > { %v1977_v13 = vpop.permute.xlu0 %1976 }
0x109f   : > { %v3046_v11 = vpop.eup %3045 }
0x10a0   : > { %v1808_v12 = vmul.f32 %v3046_v11, %v3042_v6 }
0x10a2   : > { %2909 = vmatmul.mubr.msk.f32.vlgmr.msra.gmra.mxu1 %vm977_vm4, %v1808_v12 }
0x10a3   : > { %2917 = vmatpush3.msra.mxu1 %v1977_v13  ;;  %2918 = vmatprep.mubr.msk.f32.mxu1 %vm3119_vm0, %v3118_v3 }
0x10a4   : > { %v3048_v14 = vpop.eup %3047  ;;  %2928 = vmatprep.subr.mxu1 %v3118_v3 }
0x10a5   : > { %v1975_v16 = vmul.f32 %v3048_v14, %v3044_v7 }
0x10a7   : > { %2919 = vmatmul.mubr.msk.f32.vlgmr.msra.gmra.mxu1 %vm977_vm4, %v1975_v16 }
0x10a8   : > { %2929 = vmatpush3.msra.mxu1 %v2649_v17  ;;  %2932 = vmatprep.mubr.msk.f32.mxu1 %vm3119_vm0, %v3118_v3 }
0x10a9   : > { %2930 = vmatprep.subr.mxu1 %v3118_v3 }
0x10aa   : > { %2931 = vmatpush3.msra.mxu1 %v2648_v18 }
0x10ab   : > { %2946 = vmatprep.subr.mxu1 %v3118_v3 }
0x1162   : > { %v1881_v21 = vpop.f32.mrf.mxu1 }
0x1163   : > { %2933 = vmatmul.mubr.msk.f32.vlgmr.msra.gmra.mxu1 %vm894_vm3, %v1881_v21  ;;  %v2459_v21 = vld [vmem:[%s3770_s19 + $0x18] sm:$0xff] }
0x1164   : > { %v2910_v22 = vpop.f32.mrf.mxu1  ;;  %2962 = vmatprep.mubr.msk.f32.mxu1 %vm3119_vm0, %v3118_v3  ;;  %2947 = vmatpush3.msra.mxu1 %v2680_v52 }
0x1165   : > { %2948 = vmatprep.subr.mxu1 %v3118_v3  ;;  %v2458_v22 = vld [vmem:[%s3770_s19 + $0x10] sm:$0xff] }
0x1166   : > { %2949 = vmatpush3.msra.mxu1 %v2679_v53 }
0x1167   : > { %v2048_v23 = vpop.f32.mrf.mxu1  ;;  %2950 = vmatprep.subr.mxu1 %v3118_v3 }
0x1168   : > { %2926 = vmatmul.mubr.msk.f32.vlgmr.msra.gmra.mxu0 %vm894_vm3, %v2048_v23  ;;  %2951 = vmatpush3.msra.mxu1 %v2678_v54  ;;  %v2457_v23 = vld [vmem:[%s3770_s19 + $0x8] sm:$0xff] }
0x1169   : > { %v2920_v24 = vpop.f32.mrf.mxu1  ;;  %2943 = vmatprep.mubr.msk.f32.mxu0 %vm3119_vm0, %v3118_v3  ;;  %2936 = vmatpush3.msra.mxu0 %v2669_v39 }
0x116a   : > { %2937 = vmatprep.subr.mxu0 %v3118_v3  ;;  %2952 = vmatprep.subr.mxu1 %v3118_v3  ;;  %v2456_v24 = vld [vmem:[%s3770_s19] sm:$0xff] }
0x116b   : > { %2938 = vmatpush3.msra.mxu0 %v2668_v40  ;;  %2953 = vmatpush3.msra.mxu1 %v2677_v55 }
0x116c   : > { %2939 = vmatprep.subr.mxu0 %v3118_v3  ;;  %2954 = vmatprep.subr.mxu1 %v3118_v3 }
0x116d   : > { %2940 = vmatpush3.msra.mxu0 %v2667_v41  ;;  %2955 = vmatpush3.msra.mxu1 %v2676_v56 }
0x116e   : > { %2941 = vmatprep.subr.mxu0 %v3118_v3  ;;  %2956 = vmatprep.subr.mxu1 %v3118_v3 }
0x116f   : > { %2942 = vmatpush3.msra.mxu0 %v2666_v42  ;;  %2957 = vmatpush3.msra.mxu1 %v2675_v57 }
0x1170   : > { %2965 = vmatprep.subr.mxu0 %v3118_v3  ;;  %2958 = vmatprep.subr.mxu1 %v3118_v3 }
0x1171   : > { %2959 = vmatpush3.msra.mxu1 %v2674_v58 }
0x1172   : > { %2960 = vmatprep.subr.mxu1 %v3118_v3 }
0x1173   : > { %2961 = vmatpush3.msra.mxu1 %v2673_v59 }
0x1223   : > { %v2194_v25 = vpop.f32.mrf.mxu1 }
0x1225   : > { %v2934_v26 = vpop.f32.mrf.mxu1 }
0x1228   : > { %v2121_v27 = vpop.f32.mrf.mxu0 }
0x1229   : > { %v2195_v29 = vadd.f32 %v2194_v25, %v2121_v27 }
0x122a   : > { %v2927_v30 = vpop.f32.mrf.mxu0 }
0x122b   : > { %v2206_v31 = vadd.f32 %v2661_v28, %v2195_v29  ;;  %v2686_v29 = vld [vmem:[%s3768_s17 + $0x1] ss:$0 sm:$0xff] }
0x122d   : > { %v2207_v32 = vadd.f32 %v2206_v31, %v3555_v44  ;;  %v2687_v31 = vld [vmem:[%s3769_s18 + $0x1] ss:$0 sm:$0xff] }
0x122f   : > { %v2212_v33 = vsel %vm771_vm2, %v2207_v32, 0.0 }
0x1230   : > { %2213 = vadd.xlane.f32.xlu1 %v2212_v33 }
0x12b9   : > { %v2214_v34 = vpop.xlane.xlu1 %2213 }
0x12ba   : > { %v2215_v35 = vmul.f32 0.03125, %v2214_v34 }
0x12bc   : > { %v2216_v36 = vsub.f32 %v2207_v32, %v2215_v35 }
0x12be   : > { %v2217_v37 = vmul.f32 %v2216_v36, %v2216_v36 }
0x12c0   : > { %v2218_v38 = vsel %vm771_vm2, %v2217_v37, 0.0 }
0x12c1   : > { %2219 = vadd.xlane.f32.xlu0 %v2218_v38 }
0x134a   : > { %v2220_v43 = vpop.xlane.xlu0 %2219 }
0x134b   : > { %v2221_v44 = vmul.f32 0.03125, %v2220_v43 }
0x134d   : > { %v2222_v45 = vadd.f32 1e-12, %v2221_v44 }
0x134f   : > { %3049 = vrsqrt.f32 %v2222_v45 }
0x135c   : > { %v3050_v46 = vpop.eup %3049 }
0x135d   : > { %v2224_v48 = vmul.f32 %v3050_v46, %v2216_v36 }
0x135f   : > { %v2231_v50 = vmul.f32 %v2664_v47, %v2224_v48 }
0x1361   : > { %v2238_v51 = vadd.f32 %v2665_v49, %v2231_v50 }
0x1363   : > { %2944 = vmatmul.mubr.msk.f32.vlgmr.msra.gmra.mxu0 %vm771_vm2, %v2238_v51 }
0x1364   : > { %2973 = vmatprep.mubr.msk.f32.mxu0 %vm3119_vm0, %v3118_v3  ;;  %2966 = vmatpush3.msra.mxu0 %v2459_v21 }
0x1365   : > { %2967 = vmatprep.subr.mxu0 %v3118_v3 }
0x1366   : > { %2968 = vmatpush3.msra.mxu0 %v2458_v22 }
0x1367   : > { %2969 = vmatprep.subr.mxu0 %v3118_v3 }
0x1368   : > { %2970 = vmatpush3.msra.mxu0 %v2457_v23 }
0x1369   : > { %2971 = vmatprep.subr.mxu0 %v3118_v3  ;;  %v2460_v3 = vld [vmem:[%s3803_s0] sm:$0x1] }
0x136a   : > { %2972 = vmatpush3.msra.mxu0 %v2456_v24 }
0x1423   : > { %v2321_v61 = vpop.f32.mrf.mxu0 }
0x1424   : > { %v2322_v62 = vadd.f32 %v2671_v60, %v2321_v61 }
0x1425   : > { %v2945_v63 = vpop.f32.mrf.mxu0 }
0x1426   : > { %v2325_v0 = vmul.f32 %v2322_v62, %v2322_v62 }
0x1428   : > { %v2326_v1 = vmul.f32 %v2325_v0, %v2322_v62 }
0x142a   : > { %v2327_v2 = vmul.f32 0.044715, %v2326_v1 }
0x142c   : > { %v2328_v4 = vadd.f32 %v2327_v2, %v2322_v62 }
0x142e   : > { %v2329_v5 = vmul.f32 0.7978846, %v2328_v4 }
0x1430   : > { %3051 = vtanh.f32 %v2329_v5 }
0x143d   : > { %v3052_v6 = vpop.eup %3051 }
0x143e   : > { %v2331_v15 = vadd.f32 1.0, %v3052_v6 }
0x1440   : > { %v2332_v7 = vmul.f32 0.5, %v2331_v15 }
0x1442   : > { %v2333_v8 = vmul.f32 %v2332_v7, %v2322_v62 }
0x1444   : > { %2963 = vmatmul.mubr.msk.f32.vlgmr.msra.gmra.mxu1 %vm1524_vm5, %v2333_v8 }
0x1504   : > { %v2420_v10 = vpop.f32.mrf.mxu1 }
0x1505   : > { %v2421_v11 = vadd.f32 %v2682_v9, %v2420_v10 }
0x1506   : > { %v2964_v12 = vpop.f32.mrf.mxu1 }
0x1507   : > { %v2424_v13 = vadd.f32 %v2421_v11, %v2238_v51 }
0x1509   : > { %v2429_v14 = vsel %vm771_vm2, %v2424_v13, 0.0 }
0x150a   : > { %2430 = vadd.xlane.f32.xlu1 %v2429_v14 }
0x1593   : > { %v2431_v16 = vpop.xlane.xlu1 %2430 }
0x1594   : > { %v2432_v17 = vmul.f32 0.03125, %v2431_v16 }
0x1596   : > { %v2433_v18 = vsub.f32 %v2424_v13, %v2432_v17 }
0x1598   : > { %v2434_v19 = vmul.f32 %v2433_v18, %v2433_v18 }
0x159a   : > { %v2435_v20 = vsel %vm771_vm2, %v2434_v19, 0.0 }
0x159b   : > { %2436 = vadd.xlane.f32.xlu1 %v2435_v20 }
0x1624   : > { %v2437_v25 = vpop.xlane.xlu1 %2436 }
0x1625   : > { %v2438_v26 = vmul.f32 0.03125, %v2437_v25 }
0x1627   : > { %v2439_v27 = vadd.f32 1e-12, %v2438_v26 }
0x1629   : > { %3053 = vrsqrt.f32 %v2439_v27 }
0x1636   : > { %v3054_v28 = vpop.eup %3053 }
0x1637   : > { %v2441_v30 = vmul.f32 %v3054_v28, %v2433_v18 }
0x1639   : > { %v2448_v32 = vmul.f32 %v2686_v29, %v2441_v30 }
0x163b   : > { %v2455_v33 = vadd.f32 %v2687_v31, %v2448_v32 }
0x163d   : > { %2974 = vmatmul.mubr.msk.f32.vlgmr.msra.gmra.mxu0 %vm771_vm2, %v2455_v33 }
0x16fd   : > { %v2530_v34 = vpop.f32.mrf.mxu0 }
0x16fe   : > { %v2531_v35 = vadd.f32 %v2530_v34, %v2460_v3 }
0x16ff   : > { %v2975_v36 = vpop.f32.mrf.mxu0 }
0x1700   : > { %2534 = vst [vmem:[%s657_s26] sm:$0x1] %v2531_v35 }
0x1701   : > { %3068 = shalt.err (!%p3065_p3)
}
0x1702   : > { %s3069_s0 = scalar_lea.hbm %s3716_s27, 16  ;;  %s3073_s26 = scalar_lea.hbm %s3804_s21, 32 }
0x1703   : > { %p3070_p4 = scmp.ne.s32.totalorder %s3716_s27, %s3069_s0  ;;  %p3074_p9 = scmp.lt.s32.totalorder %s3716_s27, %s3804_s21 }
0x1704   : > { %p3075_p10 = scmp.lt.s32.totalorder %s3073_s26, %s3069_s0 }
0x1705   : > { %p3071_p7 = pnand %p3070_p4, %p3275_p5 }
0x1706   : > { %p3076_p11 = por %p3075_p10, %p3074_p9 }
0x1707   : > { %p3072_p8 = pneg %p3071_p7 }
0x1709   : > { %p3077_p12 = pnand %p3076_p11, %p3072_p8 }
0x170b   : > { %3080 = shalt.err (!%p3077_p12)
}
0x170c   : > { %2976 = dma.vmem_to_hbm [thread:$0]  (%p3275_p5), %s2549_s29, 16, %s3716_s27, %s2536_s30  }
0x170d PF: > { %s3805_s22 = sld [smem:[#allocation7_spill]] }
0x170e   : > { %s3806_s1 = sld [smem:[#allocation5_spill]] }
0x1713   : > { %p2982_p13 = scmp.ge.s32.totalorder %s3805_s22, 2 }
0x1714   : > { %s2560_s28 = sand.u32 1, %s3806_s1  }
0x1715   : > { %p2979_p0 = pnand %p2982_p13, %p3279_p6  ;;  %s2561_s4 = scalar_lea.sflag [#allocation3], %s2560_s28 }
0x1717   : > { %p2980_p1 = pneg %p2979_p0 }
0x1719   : > { %3098 = dma.done.wait (%p2980_p1), %s2561_s4, 16  }
0x171a   : > { %3100 = vsyncadd (%p2980_p1), %s2561_s4, 4294967280  ;;  %s3808_s27 = sld [smem:[#allocation8_spill]]  ;;  %s3811_s2 = smov %s3107_s25 }
0x171b   : > { %s3809_s0 = sld [smem:[#allocation6_spill]] }
0x171c   : > { %s3810_s26 = sld [smem:[#allocation9_spill]] }
0x1720   : > { %p31_p2 = scmp.ge.s32.totalorder %s3808_s27, 4  }
0x1721   : > { %s3812_s25 = smov %s3809_s0 }
0x1722   :  { %33 = sbr.rel (!%p31_p2) target bundleno = 12 (0xc), region = 154 }
0x1727   :  { %2565 = vsyncpa [#allocation3], 1 }
0x1728   :  { %2567 = vsyncpa [#allocation3 + $0x1], 1 }

</bundles_post_ra>
